<compile_context>
chip_gen: v7x
topology: tpu7x:2x2x1
jax: 0.10.0
libtpu: 0.0.40
codegen_flags: <defaults>
</compile_context>

<pallas_src>
import functools

import jax
import jax.numpy as jnp
from jax.experimental import pallas as pl
from jax.experimental.pallas import tpu as pltpu


# ----------------------------------------------------------------------------
# Fused 2-layer LSTM kernel (single invocation, everything resident in VMEM).
# ----------------------------------------------------------------------------
def _fused_encoder_lstm_kernel(
    x2d_ref, wih0_ref, whh0_ref, b0_ref, wih1_ref, whh1_ref, b1_ref,
    hidden_ref, cell_ref,
    ih_scr, y0_scr,
    *, seq_len, batch_pad, hidden_size, mm_dtype):
  T, Bp, H = seq_len, batch_pad, hidden_size

  def gate_step(ih_rows, h, c, whh_ref):
    # gates = (x @ W_ih + b) [precomputed] + h @ W_hh ; PyTorch (i, f, g, o).
    gates = ih_rows + jnp.dot(h.astype(mm_dtype), whh_ref[...],
                              preferred_element_type=jnp.float32)
    i_g = jax.nn.sigmoid(gates[:, 0 * H:1 * H])
    f_g = jax.nn.sigmoid(gates[:, 1 * H:2 * H])
    g_g = jnp.tanh(gates[:, 2 * H:3 * H])
    o_g = jax.nn.sigmoid(gates[:, 3 * H:4 * H])
    c_new = f_g * c + i_g * g_g
    h_new = o_g * jnp.tanh(c_new)
    return h_new, c_new

  # --- Phase 1: layer-0 input projection, hoisted out of the recurrence.
  # One (T*Bp, E) @ (E, 4H) MXU matmul instead of T tiny (Bp, E) ones.
  ih_scr[...] = (
      jnp.dot(x2d_ref[...].astype(mm_dtype), wih0_ref[...],
              preferred_element_type=jnp.float32) + b0_ref[...])

  zeros = jnp.zeros((Bp, H), jnp.float32)

  # --- Phase 2: layer-0 recurrence; per-step outputs stay in VMEM scratch.
  def step0(t, carry):
    h, c = carry
    row = pl.multiple_of(t * Bp, Bp)
    h_new, c_new = gate_step(ih_scr[pl.ds(row, Bp), :], h, c, whh0_ref)
    y0_scr[pl.ds(row, Bp), :] = h_new
    return h_new, c_new

  h0, c0 = jax.lax.fori_loop(0, T, step0, (zeros, zeros), unroll=True)

  # --- Phase 3: layer-1 input projection over the whole layer-0 output
  # sequence (reuses ih_scr; y0 never touches HBM). Inter-layer dropout is
  # identity in eval mode.
  ih_scr[...] = (
      jnp.dot(y0_scr[...].astype(mm_dtype), wih1_ref[...],
              preferred_element_type=jnp.float32) + b1_ref[...])

  # --- Phase 4: layer-1 recurrence; only the final (h, c) are needed, so no
  # per-step output stores at all.
  def step1(t, carry):
    h, c = carry
    row = pl.multiple_of(t * Bp, Bp)
    return gate_step(ih_scr[pl.ds(row, Bp), :], h, c, whh1_ref)

  h1, c1 = jax.lax.fori_loop(0, T, step1, (zeros, zeros), unroll=True)

  # --- Final states: single store per layer (no per-step h/c writes).
  hidden_ref[0] = h0.astype(hidden_ref.dtype)
  hidden_ref[1] = h1.astype(hidden_ref.dtype)
  cell_ref[0] = c0.astype(cell_ref.dtype)
  cell_ref[1] = c1.astype(cell_ref.dtype)


def _run_fused_lstm(emb2d, lstm_params, *, seq_len, batch_pad, hidden_size,
                    mm_dtype=jnp.float32):
  T, Bp, H = seq_len, batch_pad, hidden_size
  E = emb2d.shape[-1]
  lp0, lp1 = lstm_params

  kernel = functools.partial(
      _fused_encoder_lstm_kernel, seq_len=T, batch_pad=Bp, hidden_size=H,
      mm_dtype=mm_dtype)

  vmem_spec = pl.BlockSpec(memory_space=pltpu.MemorySpace.VMEM)

  # Advisory cost model so XLA schedules the surrounding gather/slices sanely.
  flops = 2 * T * Bp * 4 * H * (E + 3 * H)          # 2 ih matmuls + 2 recurrences
  transcendentals = 2 * T * Bp * 5 * H              # 4 gate nonlins + tanh(c)
  bytes_accessed = 4 * (T * Bp * E                  # embeddings in
                        + (E + 3 * H) * 4 * H       # weights
                        + 2 * 4 * H                 # biases
                        + 2 * 2 * Bp * H)           # hidden/cell out

  hidden, cell = pl.pallas_call(
      kernel,
      out_shape=(jax.ShapeDtypeStruct((2, Bp, H), jnp.float32),
                 jax.ShapeDtypeStruct((2, Bp, H), jnp.float32)),
      in_specs=[vmem_spec] * 7,
      out_specs=(vmem_spec, vmem_spec),
      scratch_shapes=[
          pltpu.VMEM((T * Bp, 4 * H), jnp.float32),  # ih buffer (reused by both layers)
          pltpu.VMEM((T * Bp, H), jnp.float32),      # layer-0 output sequence
      ],
      cost_estimate=pl.CostEstimate(
          flops=flops, transcendentals=transcendentals,
          bytes_accessed=bytes_accessed),
  )(emb2d,
    lp0["w_ih_t"].astype(mm_dtype), lp0["w_hh_t"].astype(mm_dtype), lp0["b"],
    lp1["w_ih_t"].astype(mm_dtype), lp1["w_hh_t"].astype(mm_dtype), lp1["b"])
  return hidden, cell


# ----------------------------------------------------------------------------
# Encoder forward: embedding lookup (glue) + fused Pallas LSTM stack.
# ----------------------------------------------------------------------------
def encoder_forward(x_idx, params, *, mm_dtype=jnp.float32):
  """(T, B) int32 token ids -> (hidden, cell), each (num_layers, B, H)."""
  emb = jnp.take(params["embedding"], x_idx, axis=0)  # (T, B, E)
  # nn.Dropout(p) on embeddings -> identity (inference semantics).
  # TODO(synk): training-mode dropout (embeddings + inter-layer) via pltpu PRNG.
  T, B, E = emb.shape
  lstm_params = params["lstm"]
  assert len(lstm_params) == 2, "fused kernel is written for num_layers=2"
  H = lstm_params[0]["w_hh_t"].shape[0]

  Bp = max(8, -(-B // 8) * 8)  # pad batch to the f32 sublane width
  if Bp != B:
    emb = jnp.pad(emb, ((0, 0), (0, Bp - B), (0, 0)))
  emb2d = emb.reshape(T * Bp, E)  # merge leading dims; lane dim untouched

  hidden, cell = _run_fused_lstm(
      emb2d, lstm_params, seq_len=T, batch_pad=Bp, hidden_size=H,
      mm_dtype=mm_dtype)
  return hidden[:, :B, :], cell[:, :B, :]


# ----------------------------------------------------------------------------
# Pure-JAX reference (lax.scan) for correctness check.
# ----------------------------------------------------------------------------
def encoder_forward_ref(x_idx, params):
  emb = jnp.take(params["embedding"], x_idx, axis=0)

  def layer_scan(x_seq, lp):
    H = lp["w_hh_t"].shape[0]
    B = x_seq.shape[1]

    def step(carry, x_t):
      h, c = carry
      gates = x_t @ lp["w_ih_t"] + h @ lp["w_hh_t"] + lp["b"]
      i_g = jax.nn.sigmoid(gates[:, 0 * H:1 * H])
      f_g = jax.nn.sigmoid(gates[:, 1 * H:2 * H])
      g_g = jnp.tanh(gates[:, 2 * H:3 * H])
      o_g = jax.nn.sigmoid(gates[:, 3 * H:4 * H])
      c_new = f_g * c + i_g * g_g
      h_new = o_g * jnp.tanh(c_new)
      return (h_new, c_new), h_new

    init = (jnp.zeros((B, H), jnp.float32), jnp.zeros((B, H), jnp.float32))
    (h, c), y = jax.lax.scan(step, init, x_seq)
    return y, h, c

  h_list, c_list = [], []
  layer_in = emb
  for lp in params["lstm"]:
    y, h, c = layer_scan(layer_in, lp)
    h_list.append(h)
    c_list.append(c)
    layer_in = y
  return jnp.stack(h_list, 0), jnp.stack(c_list, 0)


# ----------------------------------------------------------------------------
# Deterministic parameter init (shapes follow nn.Embedding / nn.LSTM).
# ----------------------------------------------------------------------------
def init_params(key, input_size, embedding_size, hidden_size, num_layers):
  k_emb, key = jax.random.split(key)
  params = {
      "embedding": jax.random.normal(
          k_emb, (input_size, embedding_size), jnp.float32),
      "lstm": [],
  }
  bound = 1.0 / jnp.sqrt(hidden_size)
  for layer in range(num_layers):
    d_in = embedding_size if layer == 0 else hidden_size
    k1, k2, k3, k4, key = jax.random.split(key, 5)
    w_ih = jax.random.uniform(k1, (4 * hidden_size, d_in),
                              jnp.float32, -bound, bound)
    w_hh = jax.random.uniform(k2, (4 * hidden_size, hidden_size),
                              jnp.float32, -bound, bound)
    b_ih = jax.random.uniform(k3, (4 * hidden_size,),
                              jnp.float32, -bound, bound)
    b_hh = jax.random.uniform(k4, (4 * hidden_size,),
                              jnp.float32, -bound, bound)
    params["lstm"].append({
        "w_ih_t": w_ih.T,                      # (d_in, 4H)
        "w_hh_t": w_hh.T,                      # (H, 4H)
        "b": (b_ih + b_hh)[None, :],           # (1, 4H)
    })
  return params


if __name__ == "__main__":
  # Small shapes consistent with the module's forward (seq-first (T, B) ids).
  input_size = 50        # vocab
  embedding_size = 16
  hidden_size = 32       # 4H = 128 -> lane-aligned gate block
  num_layers = 2
  seq_len = 8
  batch = 2

  key = jax.random.PRNGKey(0)
  k_params, k_x = jax.random.split(key)
  params = init_params(k_params, input_size, embedding_size,
                       hidden_size, num_layers)
  x = jax.random.randint(k_x, (seq_len, batch), 0, input_size, jnp.int32)

  hidden, cell = encoder_forward(x, params)
  hidden = jax.block_until_ready(hidden)
  cell = jax.block_until_ready(cell)

  hidden_ref, cell_ref = encoder_forward_ref(x, params)
  assert hidden.shape == (num_layers, batch, hidden_size)
  assert cell.shape == (num_layers, batch, hidden_size)
  assert jnp.allclose(hidden, hidden_ref, atol=2e-5), "hidden mismatch"
  assert jnp.allclose(cell, cell_ref, atol=2e-5), "cell mismatch"

  print("KERNEL_OK")
</pallas_src>

<mosaic_0001>
module attributes {stable_mosaic.version = 11 : i64} {
  func.func @_fused_encoder_lstm_kernel(%arg0: memref<64x16xf32, #tpu.memory_space<vmem>>, %arg1: memref<16x128xf32, #tpu.memory_space<vmem>>, %arg2: memref<32x128xf32, #tpu.memory_space<vmem>>, %arg3: memref<1x128xf32, #tpu.memory_space<vmem>>, %arg4: memref<32x128xf32, #tpu.memory_space<vmem>>, %arg5: memref<32x128xf32, #tpu.memory_space<vmem>>, %arg6: memref<1x128xf32, #tpu.memory_space<vmem>>, %arg7: memref<2x8x32xf32, #tpu.memory_space<vmem>>, %arg8: memref<2x8x32xf32, #tpu.memory_space<vmem>>, %arg9: memref<64x128xf32, #tpu.memory_space<vmem>>, %arg10: memref<64x32xf32, #tpu.memory_space<vmem>>) attributes {dimension_semantics = [], scalar_prefetch = 0 : i64, scratch_operands = 2 : i64, tpu.core_type = #tpu.core_type<tc>} {
    %c0 = arith.constant 0 : index
    %c0_0 = arith.constant 0 : index
    %0 = vector.load %arg0[%c0, %c0_0] : memref<64x16xf32, #tpu.memory_space<vmem>>, vector<64x16xf32>
    %c0_1 = arith.constant 0 : index
    %c0_2 = arith.constant 0 : index
    %1 = vector.load %arg1[%c0_1, %c0_2] : memref<16x128xf32, #tpu.memory_space<vmem>>, vector<16x128xf32>
    %cst = arith.constant dense<0.000000e+00> : vector<64x128xf32>
    %2 = tpu.matmul %0, %1, %cst {dimension_numbers = #tpu.dot_dimension_numbers<[1], [0], [0], [1], [0, 0, 1, 1], [], []>} : vector<64x16xf32>, vector<16x128xf32>, vector<64x128xf32> -> vector<64x128xf32>
    %c0_3 = arith.constant 0 : index
    %c0_4 = arith.constant 0 : index
    %3 = vector.load %arg3[%c0_3, %c0_4] : memref<1x128xf32, #tpu.memory_space<vmem>>, vector<1x128xf32>
    %4 = vector.broadcast %3 : vector<1x128xf32> to vector<64x128xf32>
    %5 = arith.addf %2, %4 : vector<64x128xf32>
    %c0_5 = arith.constant 0 : index
    %c0_6 = arith.constant 0 : index
    %6 = vector.load %arg9[%c0_5, %c0_6] : memref<64x128xf32, #tpu.memory_space<vmem>>, vector<64x128xf32>
    tpu.vector_store %arg9[%c0_5, %c0_6], %5 {strides = array<i32>} : memref<64x128xf32, #tpu.memory_space<vmem>>, vector<64x128xf32>,
    %cst_7 = arith.constant 0.000000e+00 : f32
    %7 = vector.broadcast %cst_7 : f32 to vector<8x32xf32>
    %c0_i32 = arith.constant 0 : i32
    %c8_i32 = arith.constant 8 : i32
    %8 = arith.muli %c0_i32, %c8_i32 : i32
    %9 = tpu.assume_multiple %8, 8 : i32
    %10 = arith.index_cast %9 : i32 to index
    %c0_8 = arith.constant 0 : index
    %11 = vector.load %arg9[%10, %c0_8] : memref<64x128xf32, #tpu.memory_space<vmem>>, vector<8x128xf32>
    %c0_9 = arith.constant 0 : index
    %c0_10 = arith.constant 0 : index
    %12 = vector.load %arg2[%c0_9, %c0_10] : memref<32x128xf32, #tpu.memory_space<vmem>>, vector<32x128xf32>
    %cst_11 = arith.constant dense<0.000000e+00> : vector<8x128xf32>
    %13 = tpu.matmul %7, %12, %cst_11 {dimension_numbers = #tpu.dot_dimension_numbers<[1], [0], [0], [1], [0, 0, 1, 1], [], []>} : vector<8x32xf32>, vector<32x128xf32>, vector<8x128xf32> -> vector<8x128xf32>
    %14 = arith.addf %11, %13 : vector<8x128xf32>
    %15 = vector.extract_strided_slice %14 {offsets = [0, 0], sizes = [8, 32], strides = [1, 1]} : vector<8x128xf32> to vector<8x32xf32>
    %16 = arith.negf %15 : vector<8x32xf32>
    %17 = math.exp %16 : vector<8x32xf32>
    %cst_12 = arith.constant 1.000000e+00 : f32
    %18 = vector.broadcast %cst_12 : f32 to vector<8x32xf32>
    %19 = arith.addf %18, %17 : vector<8x32xf32>
    %20 = arith.divf %18, %19 : vector<8x32xf32>
    %21 = vector.extract_strided_slice %14 {offsets = [0, 32], sizes = [8, 32], strides = [1, 1]} : vector<8x128xf32> to vector<8x32xf32>
    %22 = arith.negf %21 : vector<8x32xf32>
    %23 = math.exp %22 : vector<8x32xf32>
    %cst_13 = arith.constant 1.000000e+00 : f32
    %24 = vector.broadcast %cst_13 : f32 to vector<8x32xf32>
    %25 = arith.addf %24, %23 : vector<8x32xf32>
    %26 = arith.divf %24, %25 : vector<8x32xf32>
    %27 = vector.extract_strided_slice %14 {offsets = [0, 64], sizes = [8, 32], strides = [1, 1]} : vector<8x128xf32> to vector<8x32xf32>
    %28 = math.tanh %27 : vector<8x32xf32>
    %29 = vector.extract_strided_slice %14 {offsets = [0, 96], sizes = [8, 32], strides = [1, 1]} : vector<8x128xf32> to vector<8x32xf32>
    %30 = arith.negf %29 : vector<8x32xf32>
    %31 = math.exp %30 : vector<8x32xf32>
    %cst_14 = arith.constant 1.000000e+00 : f32
    %32 = vector.broadcast %cst_14 : f32 to vector<8x32xf32>
    %33 = arith.addf %32, %31 : vector<8x32xf32>
    %34 = arith.divf %32, %33 : vector<8x32xf32>
    %35 = arith.mulf %26, %7 : vector<8x32xf32>
    %36 = arith.mulf %20, %28 : vector<8x32xf32>
    %37 = arith.addf %35, %36 : vector<8x32xf32>
    %38 = math.tanh %37 : vector<8x32xf32>
    %39 = arith.mulf %34, %38 : vector<8x32xf32>
    %40 = arith.index_cast %9 : i32 to index
    %c0_15 = arith.constant 0 : index
    %41 = vector.load %arg10[%40, %c0_15] : memref<64x32xf32, #tpu.memory_space<vmem>>, vector<8x32xf32>
    tpu.vector_store %arg10[%40, %c0_15], %39 {strides = array<i32>} : memref<64x32xf32, #tpu.memory_space<vmem>>, vector<8x32xf32>,
    %c1_i32 = arith.constant 1 : i32
    %c8_i32_16 = arith.constant 8 : i32
    %42 = arith.muli %c1_i32, %c8_i32_16 : i32
    %43 = tpu.assume_multiple %42, 8 : i32
    %44 = arith.index_cast %43 : i32 to index
    %c0_17 = arith.constant 0 : index
    %45 = vector.load %arg9[%44, %c0_17] : memref<64x128xf32, #tpu.memory_space<vmem>>, vector<8x128xf32>
    %c0_18 = arith.constant 0 : index
    %c0_19 = arith.constant 0 : index
    %46 = vector.load %arg2[%c0_18, %c0_19] : memref<32x128xf32, #tpu.memory_space<vmem>>, vector<32x128xf32>
    %cst_20 = arith.constant dense<0.000000e+00> : vector<8x128xf32>
    %47 = tpu.matmul %39, %46, %cst_20 {dimension_numbers = #tpu.dot_dimension_numbers<[1], [0], [0], [1], [0, 0, 1, 1], [], []>} : vector<8x32xf32>, vector<32x128xf32>, vector<8x128xf32> -> vector<8x128xf32>
    %48 = arith.addf %45, %47 : vector<8x128xf32>
    %49 = vector.extract_strided_slice %48 {offsets = [0, 0], sizes = [8, 32], strides = [1, 1]} : vector<8x128xf32> to vector<8x32xf32>
    %50 = arith.negf %49 : vector<8x32xf32>
    %51 = math.exp %50 : vector<8x32xf32>
    %cst_21 = arith.constant 1.000000e+00 : f32
    %52 = vector.broadcast %cst_21 : f32 to vector<8x32xf32>
    %53 = arith.addf %52, %51 : vector<8x32xf32>
    %54 = arith.divf %52, %53 : vector<8x32xf32>
    %55 = vector.extract_strided_slice %48 {offsets = [0, 32], sizes = [8, 32], strides = [1, 1]} : vector<8x128xf32> to vector<8x32xf32>
    %56 = arith.negf %55 : vector<8x32xf32>
    %57 = math.exp %56 : vector<8x32xf32>
    %cst_22 = arith.constant 1.000000e+00 : f32
    %58 = vector.broadcast %cst_22 : f32 to vector<8x32xf32>
    %59 = arith.addf %58, %57 : vector<8x32xf32>
    %60 = arith.divf %58, %59 : vector<8x32xf32>
    %61 = vector.extract_strided_slice %48 {offsets = [0, 64], sizes = [8, 32], strides = [1, 1]} : vector<8x128xf32> to vector<8x32xf32>
    %62 = math.tanh %61 : vector<8x32xf32>
    %63 = vector.extract_strided_slice %48 {offsets = [0, 96], sizes = [8, 32], strides = [1, 1]} : vector<8x128xf32> to vector<8x32xf32>
    %64 = arith.negf %63 : vector<8x32xf32>
    %65 = math.exp %64 : vector<8x32xf32>
    %cst_23 = arith.constant 1.000000e+00 : f32
    %66 = vector.broadcast %cst_23 : f32 to vector<8x32xf32>
    %67 = arith.addf %66, %65 : vector<8x32xf32>
    %68 = arith.divf %66, %67 : vector<8x32xf32>
    %69 = arith.mulf %60, %37 : vector<8x32xf32>
    %70 = arith.mulf %54, %62 : vector<8x32xf32>
    %71 = arith.addf %69, %70 : vector<8x32xf32>
    %72 = math.tanh %71 : vector<8x32xf32>
    %73 = arith.mulf %68, %72 : vector<8x32xf32>
    %74 = arith.index_cast %43 : i32 to index
    %c0_24 = arith.constant 0 : index
    %75 = vector.load %arg10[%74, %c0_24] : memref<64x32xf32, #tpu.memory_space<vmem>>, vector<8x32xf32>
    tpu.vector_store %arg10[%74, %c0_24], %73 {strides = array<i32>} : memref<64x32xf32, #tpu.memory_space<vmem>>, vector<8x32xf32>,
    %c2_i32 = arith.constant 2 : i32
    %c8_i32_25 = arith.constant 8 : i32
    %76 = arith.muli %c2_i32, %c8_i32_25 : i32
    %77 = tpu.assume_multiple %76, 8 : i32
    %78 = arith.index_cast %77 : i32 to index
    %c0_26 = arith.constant 0 : index
    %79 = vector.load %arg9[%78, %c0_26] : memref<64x128xf32, #tpu.memory_space<vmem>>, vector<8x128xf32>
    %c0_27 = arith.constant 0 : index
    %c0_28 = arith.constant 0 : index
    %80 = vector.load %arg2[%c0_27, %c0_28] : memref<32x128xf32, #tpu.memory_space<vmem>>, vector<32x128xf32>
    %cst_29 = arith.constant dense<0.000000e+00> : vector<8x128xf32>
    %81 = tpu.matmul %73, %80, %cst_29 {dimension_numbers = #tpu.dot_dimension_numbers<[1], [0], [0], [1], [0, 0, 1, 1], [], []>} : vector<8x32xf32>, vector<32x128xf32>, vector<8x128xf32> -> vector<8x128xf32>
    %82 = arith.addf %79, %81 : vector<8x128xf32>
    %83 = vector.extract_strided_slice %82 {offsets = [0, 0], sizes = [8, 32], strides = [1, 1]} : vector<8x128xf32> to vector<8x32xf32>
    %84 = arith.negf %83 : vector<8x32xf32>
    %85 = math.exp %84 : vector<8x32xf32>
    %cst_30 = arith.constant 1.000000e+00 : f32
    %86 = vector.broadcast %cst_30 : f32 to vector<8x32xf32>
    %87 = arith.addf %86, %85 : vector<8x32xf32>
    %88 = arith.divf %86, %87 : vector<8x32xf32>
    %89 = vector.extract_strided_slice %82 {offsets = [0, 32], sizes = [8, 32], strides = [1, 1]} : vector<8x128xf32> to vector<8x32xf32>
    %90 = arith.negf %89 : vector<8x32xf32>
    %91 = math.exp %90 : vector<8x32xf32>
    %cst_31 = arith.constant 1.000000e+00 : f32
    %92 = vector.broadcast %cst_31 : f32 to vector<8x32xf32>
    %93 = arith.addf %92, %91 : vector<8x32xf32>
    %94 = arith.divf %92, %93 : vector<8x32xf32>
    %95 = vector.extract_strided_slice %82 {offsets = [0, 64], sizes = [8, 32], strides = [1, 1]} : vector<8x128xf32> to vector<8x32xf32>
    %96 = math.tanh %95 : vector<8x32xf32>
    %97 = vector.extract_strided_slice %82 {offsets = [0, 96], sizes = [8, 32], strides = [1, 1]} : vector<8x128xf32> to vector<8x32xf32>
    %98 = arith.negf %97 : vector<8x32xf32>
    %99 = math.exp %98 : vector<8x32xf32>
    %cst_32 = arith.constant 1.000000e+00 : f32
    %100 = vector.broadcast %cst_32 : f32 to vector<8x32xf32>
    %101 = arith.addf %100, %99 : vector<8x32xf32>
    %102 = arith.divf %100, %101 : vector<8x32xf32>
    %103 = arith.mulf %94, %71 : vector<8x32xf32>
    %104 = arith.mulf %88, %96 : vector<8x32xf32>
    %105 = arith.addf %103, %104 : vector<8x32xf32>
    %106 = math.tanh %105 : vector<8x32xf32>
    %107 = arith.mulf %102, %106 : vector<8x32xf32>
    %108 = arith.index_cast %77 : i32 to index
    %c0_33 = arith.constant 0 : index
    %109 = vector.load %arg10[%108, %c0_33] : memref<64x32xf32, #tpu.memory_space<vmem>>, vector<8x32xf32>
    tpu.vector_store %arg10[%108, %c0_33], %107 {strides = array<i32>} : memref<64x32xf32, #tpu.memory_space<vmem>>, vector<8x32xf32>,
    %c3_i32 = arith.constant 3 : i32
    %c8_i32_34 = arith.constant 8 : i32
    %110 = arith.muli %c3_i32, %c8_i32_34 : i32
    %111 = tpu.assume_multiple %110, 8 : i32
    %112 = arith.index_cast %111 : i32 to index
    %c0_35 = arith.constant 0 : index
    %113 = vector.load %arg9[%112, %c0_35] : memref<64x128xf32, #tpu.memory_space<vmem>>, vector<8x128xf32>
    %c0_36 = arith.constant 0 : index
    %c0_37 = arith.constant 0 : index
    %114 = vector.load %arg2[%c0_36, %c0_37] : memref<32x128xf32, #tpu.memory_space<vmem>>, vector<32x128xf32>
    %cst_38 = arith.constant dense<0.000000e+00> : vector<8x128xf32>
    %115 = tpu.matmul %107, %114, %cst_38 {dimension_numbers = #tpu.dot_dimension_numbers<[1], [0], [0], [1], [0, 0, 1, 1], [], []>} : vector<8x32xf32>, vector<32x128xf32>, vector<8x128xf32> -> vector<8x128xf32>
    %116 = arith.addf %113, %115 : vector<8x128xf32>
    %117 = vector.extract_strided_slice %116 {offsets = [0, 0], sizes = [8, 32], strides = [1, 1]} : vector<8x128xf32> to vector<8x32xf32>
    %118 = arith.negf %117 : vector<8x32xf32>
    %119 = math.exp %118 : vector<8x32xf32>
    %cst_39 = arith.constant 1.000000e+00 : f32
    %120 = vector.broadcast %cst_39 : f32 to vector<8x32xf32>
    %121 = arith.addf %120, %119 : vector<8x32xf32>
    %122 = arith.divf %120, %121 : vector<8x32xf32>
    %123 = vector.extract_strided_slice %116 {offsets = [0, 32], sizes = [8, 32], strides = [1, 1]} : vector<8x128xf32> to vector<8x32xf32>
    %124 = arith.negf %123 : vector<8x32xf32>
    %125 = math.exp %124 : vector<8x32xf32>
    %cst_40 = arith.constant 1.000000e+00 : f32
    %126 = vector.broadcast %cst_40 : f32 to vector<8x32xf32>
    %127 = arith.addf %126, %125 : vector<8x32xf32>
    %128 = arith.divf %126, %127 : vector<8x32xf32>
    %129 = vector.extract_strided_slice %116 {offsets = [0, 64], sizes = [8, 32], strides = [1, 1]} : vector<8x128xf32> to vector<8x32xf32>
    %130 = math.tanh %129 : vector<8x32xf32>
    %131 = vector.extract_strided_slice %116 {offsets = [0, 96], sizes = [8, 32], strides = [1, 1]} : vector<8x128xf32> to vector<8x32xf32>
    %132 = arith.negf %131 : vector<8x32xf32>
    %133 = math.exp %132 : vector<8x32xf32>
    %cst_41 = arith.constant 1.000000e+00 : f32
    %134 = vector.broadcast %cst_41 : f32 to vector<8x32xf32>
    %135 = arith.addf %134, %133 : vector<8x32xf32>
    %136 = arith.divf %134, %135 : vector<8x32xf32>
    %137 = arith.mulf %128, %105 : vector<8x32xf32>
    %138 = arith.mulf %122, %130 : vector<8x32xf32>
    %139 = arith.addf %137, %138 : vector<8x32xf32>
    %140 = math.tanh %139 : vector<8x32xf32>
    %141 = arith.mulf %136, %140 : vector<8x32xf32>
    %142 = arith.index_cast %111 : i32 to index
    %c0_42 = arith.constant 0 : index
    %143 = vector.load %arg10[%142, %c0_42] : memref<64x32xf32, #tpu.memory_space<vmem>>, vector<8x32xf32>
    tpu.vector_store %arg10[%142, %c0_42], %141 {strides = array<i32>} : memref<64x32xf32, #tpu.memory_space<vmem>>, vector<8x32xf32>,
    %c4_i32 = arith.constant 4 : i32
    %c8_i32_43 = arith.constant 8 : i32
    %144 = arith.muli %c4_i32, %c8_i32_43 : i32
    %145 = tpu.assume_multiple %144, 8 : i32
    %146 = arith.index_cast %145 : i32 to index
    %c0_44 = arith.constant 0 : index
    %147 = vector.load %arg9[%146, %c0_44] : memref<64x128xf32, #tpu.memory_space<vmem>>, vector<8x128xf32>
    %c0_45 = arith.constant 0 : index
    %c0_46 = arith.constant 0 : index
    %148 = vector.load %arg2[%c0_45, %c0_46] : memref<32x128xf32, #tpu.memory_space<vmem>>, vector<32x128xf32>
    %cst_47 = arith.constant dense<0.000000e+00> : vector<8x128xf32>
    %149 = tpu.matmul %141, %148, %cst_47 {dimension_numbers = #tpu.dot_dimension_numbers<[1], [0], [0], [1], [0, 0, 1, 1], [], []>} : vector<8x32xf32>, vector<32x128xf32>, vector<8x128xf32> -> vector<8x128xf32>
    %150 = arith.addf %147, %149 : vector<8x128xf32>
    %151 = vector.extract_strided_slice %150 {offsets = [0, 0], sizes = [8, 32], strides = [1, 1]} : vector<8x128xf32> to vector<8x32xf32>
    %152 = arith.negf %151 : vector<8x32xf32>
    %153 = math.exp %152 : vector<8x32xf32>
    %cst_48 = arith.constant 1.000000e+00 : f32
    %154 = vector.broadcast %cst_48 : f32 to vector<8x32xf32>
    %155 = arith.addf %154, %153 : vector<8x32xf32>
    %156 = arith.divf %154, %155 : vector<8x32xf32>
    %157 = vector.extract_strided_slice %150 {offsets = [0, 32], sizes = [8, 32], strides = [1, 1]} : vector<8x128xf32> to vector<8x32xf32>
    %158 = arith.negf %157 : vector<8x32xf32>
    %159 = math.exp %158 : vector<8x32xf32>
    %cst_49 = arith.constant 1.000000e+00 : f32
    %160 = vector.broadcast %cst_49 : f32 to vector<8x32xf32>
    %161 = arith.addf %160, %159 : vector<8x32xf32>
    %162 = arith.divf %160, %161 : vector<8x32xf32>
    %163 = vector.extract_strided_slice %150 {offsets = [0, 64], sizes = [8, 32], strides = [1, 1]} : vector<8x128xf32> to vector<8x32xf32>
    %164 = math.tanh %163 : vector<8x32xf32>
    %165 = vector.extract_strided_slice %150 {offsets = [0, 96], sizes = [8, 32], strides = [1, 1]} : vector<8x128xf32> to vector<8x32xf32>
    %166 = arith.negf %165 : vector<8x32xf32>
    %167 = math.exp %166 : vector<8x32xf32>
    %cst_50 = arith.constant 1.000000e+00 : f32
    %168 = vector.broadcast %cst_50 : f32 to vector<8x32xf32>
    %169 = arith.addf %168, %167 : vector<8x32xf32>
    %170 = arith.divf %168, %169 : vector<8x32xf32>
    %171 = arith.mulf %162, %139 : vector<8x32xf32>
    %172 = arith.mulf %156, %164 : vector<8x32xf32>
    %173 = arith.addf %171, %172 : vector<8x32xf32>
    %174 = math.tanh %173 : vector<8x32xf32>
    %175 = arith.mulf %170, %174 : vector<8x32xf32>
    %176 = arith.index_cast %145 : i32 to index
    %c0_51 = arith.constant 0 : index
    %177 = vector.load %arg10[%176, %c0_51] : memref<64x32xf32, #tpu.memory_space<vmem>>, vector<8x32xf32>
    tpu.vector_store %arg10[%176, %c0_51], %175 {strides = array<i32>} : memref<64x32xf32, #tpu.memory_space<vmem>>, vector<8x32xf32>,
    %c5_i32 = arith.constant 5 : i32
    %c8_i32_52 = arith.constant 8 : i32
    %178 = arith.muli %c5_i32, %c8_i32_52 : i32
    %179 = tpu.assume_multiple %178, 8 : i32
    %180 = arith.index_cast %179 : i32 to index
    %c0_53 = arith.constant 0 : index
    %181 = vector.load %arg9[%180, %c0_53] : memref<64x128xf32, #tpu.memory_space<vmem>>, vector<8x128xf32>
    %c0_54 = arith.constant 0 : index
    %c0_55 = arith.constant 0 : index
    %182 = vector.load %arg2[%c0_54, %c0_55] : memref<32x128xf32, #tpu.memory_space<vmem>>, vector<32x128xf32>
    %cst_56 = arith.constant dense<0.000000e+00> : vector<8x128xf32>
    %183 = tpu.matmul %175, %182, %cst_56 {dimension_numbers = #tpu.dot_dimension_numbers<[1], [0], [0], [1], [0, 0, 1, 1], [], []>} : vector<8x32xf32>, vector<32x128xf32>, vector<8x128xf32> -> vector<8x128xf32>
    %184 = arith.addf %181, %183 : vector<8x128xf32>
    %185 = vector.extract_strided_slice %184 {offsets = [0, 0], sizes = [8, 32], strides = [1, 1]} : vector<8x128xf32> to vector<8x32xf32>
    %186 = arith.negf %185 : vector<8x32xf32>
    %187 = math.exp %186 : vector<8x32xf32>
    %cst_57 = arith.constant 1.000000e+00 : f32
    %188 = vector.broadcast %cst_57 : f32 to vector<8x32xf32>
    %189 = arith.addf %188, %187 : vector<8x32xf32>
    %190 = arith.divf %188, %189 : vector<8x32xf32>
    %191 = vector.extract_strided_slice %184 {offsets = [0, 32], sizes = [8, 32], strides = [1, 1]} : vector<8x128xf32> to vector<8x32xf32>
    %192 = arith.negf %191 : vector<8x32xf32>
    %193 = math.exp %192 : vector<8x32xf32>
    %cst_58 = arith.constant 1.000000e+00 : f32
    %194 = vector.broadcast %cst_58 : f32 to vector<8x32xf32>
    %195 = arith.addf %194, %193 : vector<8x32xf32>
    %196 = arith.divf %194, %195 : vector<8x32xf32>
    %197 = vector.extract_strided_slice %184 {offsets = [0, 64], sizes = [8, 32], strides = [1, 1]} : vector<8x128xf32> to vector<8x32xf32>
    %198 = math.tanh %197 : vector<8x32xf32>
    %199 = vector.extract_strided_slice %184 {offsets = [0, 96], sizes = [8, 32], strides = [1, 1]} : vector<8x128xf32> to vector<8x32xf32>
    %200 = arith.negf %199 : vector<8x32xf32>
    %201 = math.exp %200 : vector<8x32xf32>
    %cst_59 = arith.constant 1.000000e+00 : f32
    %202 = vector.broadcast %cst_59 : f32 to vector<8x32xf32>
    %203 = arith.addf %202, %201 : vector<8x32xf32>
    %204 = arith.divf %202, %203 : vector<8x32xf32>
    %205 = arith.mulf %196, %173 : vector<8x32xf32>
    %206 = arith.mulf %190, %198 : vector<8x32xf32>
    %207 = arith.addf %205, %206 : vector<8x32xf32>
    %208 = math.tanh %207 : vector<8x32xf32>
    %209 = arith.mulf %204, %208 : vector<8x32xf32>
    %210 = arith.index_cast %179 : i32 to index
    %c0_60 = arith.constant 0 : index
    %211 = vector.load %arg10[%210, %c0_60] : memref<64x32xf32, #tpu.memory_space<vmem>>, vector<8x32xf32>
    tpu.vector_store %arg10[%210, %c0_60], %209 {strides = array<i32>} : memref<64x32xf32, #tpu.memory_space<vmem>>, vector<8x32xf32>,
    %c6_i32 = arith.constant 6 : i32
    %c8_i32_61 = arith.constant 8 : i32
    %212 = arith.muli %c6_i32, %c8_i32_61 : i32
    %213 = tpu.assume_multiple %212, 8 : i32
    %214 = arith.index_cast %213 : i32 to index
    %c0_62 = arith.constant 0 : index
    %215 = vector.load %arg9[%214, %c0_62] : memref<64x128xf32, #tpu.memory_space<vmem>>, vector<8x128xf32>
    %c0_63 = arith.constant 0 : index
    %c0_64 = arith.constant 0 : index
    %216 = vector.load %arg2[%c0_63, %c0_64] : memref<32x128xf32, #tpu.memory_space<vmem>>, vector<32x128xf32>
    %cst_65 = arith.constant dense<0.000000e+00> : vector<8x128xf32>
    %217 = tpu.matmul %209, %216, %cst_65 {dimension_numbers = #tpu.dot_dimension_numbers<[1], [0], [0], [1], [0, 0, 1, 1], [], []>} : vector<8x32xf32>, vector<32x128xf32>, vector<8x128xf32> -> vector<8x128xf32>
    %218 = arith.addf %215, %217 : vector<8x128xf32>
    %219 = vector.extract_strided_slice %218 {offsets = [0, 0], sizes = [8, 32], strides = [1, 1]} : vector<8x128xf32> to vector<8x32xf32>
    %220 = arith.negf %219 : vector<8x32xf32>
    %221 = math.exp %220 : vector<8x32xf32>
    %cst_66 = arith.constant 1.000000e+00 : f32
    %222 = vector.broadcast %cst_66 : f32 to vector<8x32xf32>
    %223 = arith.addf %222, %221 : vector<8x32xf32>
    %224 = arith.divf %222, %223 : vector<8x32xf32>
    %225 = vector.extract_strided_slice %218 {offsets = [0, 32], sizes = [8, 32], strides = [1, 1]} : vector<8x128xf32> to vector<8x32xf32>
    %226 = arith.negf %225 : vector<8x32xf32>
    %227 = math.exp %226 : vector<8x32xf32>
    %cst_67 = arith.constant 1.000000e+00 : f32
    %228 = vector.broadcast %cst_67 : f32 to vector<8x32xf32>
    %229 = arith.addf %228, %227 : vector<8x32xf32>
    %230 = arith.divf %228, %229 : vector<8x32xf32>
    %231 = vector.extract_strided_slice %218 {offsets = [0, 64], sizes = [8, 32], strides = [1, 1]} : vector<8x128xf32> to vector<8x32xf32>
    %232 = math.tanh %231 : vector<8x32xf32>
    %233 = vector.extract_strided_slice %218 {offsets = [0, 96], sizes = [8, 32], strides = [1, 1]} : vector<8x128xf32> to vector<8x32xf32>
    %234 = arith.negf %233 : vector<8x32xf32>
    %235 = math.exp %234 : vector<8x32xf32>
    %cst_68 = arith.constant 1.000000e+00 : f32
    %236 = vector.broadcast %cst_68 : f32 to vector<8x32xf32>
    %237 = arith.addf %236, %235 : vector<8x32xf32>
    %238 = arith.divf %236, %237 : vector<8x32xf32>
    %239 = arith.mulf %230, %207 : vector<8x32xf32>
    %240 = arith.mulf %224, %232 : vector<8x32xf32>
    %241 = arith.addf %239, %240 : vector<8x32xf32>
    %242 = math.tanh %241 : vector<8x32xf32>
    %243 = arith.mulf %238, %242 : vector<8x32xf32>
    %244 = arith.index_cast %213 : i32 to index
    %c0_69 = arith.constant 0 : index
    %245 = vector.load %arg10[%244, %c0_69] : memref<64x32xf32, #tpu.memory_space<vmem>>, vector<8x32xf32>
    tpu.vector_store %arg10[%244, %c0_69], %243 {strides = array<i32>} : memref<64x32xf32, #tpu.memory_space<vmem>>, vector<8x32xf32>,
    %c7_i32 = arith.constant 7 : i32
    %c8_i32_70 = arith.constant 8 : i32
    %246 = arith.muli %c7_i32, %c8_i32_70 : i32
    %247 = tpu.assume_multiple %246, 8 : i32
    %248 = arith.index_cast %247 : i32 to index
    %c0_71 = arith.constant 0 : index
    %249 = vector.load %arg9[%248, %c0_71] : memref<64x128xf32, #tpu.memory_space<vmem>>, vector<8x128xf32>
    %c0_72 = arith.constant 0 : index
    %c0_73 = arith.constant 0 : index
    %250 = vector.load %arg2[%c0_72, %c0_73] : memref<32x128xf32, #tpu.memory_space<vmem>>, vector<32x128xf32>
    %cst_74 = arith.constant dense<0.000000e+00> : vector<8x128xf32>
    %251 = tpu.matmul %243, %250, %cst_74 {dimension_numbers = #tpu.dot_dimension_numbers<[1], [0], [0], [1], [0, 0, 1, 1], [], []>} : vector<8x32xf32>, vector<32x128xf32>, vector<8x128xf32> -> vector<8x128xf32>
    %252 = arith.addf %249, %251 : vector<8x128xf32>
    %253 = vector.extract_strided_slice %252 {offsets = [0, 0], sizes = [8, 32], strides = [1, 1]} : vector<8x128xf32> to vector<8x32xf32>
    %254 = arith.negf %253 : vector<8x32xf32>
    %255 = math.exp %254 : vector<8x32xf32>
    %cst_75 = arith.constant 1.000000e+00 : f32
    %256 = vector.broadcast %cst_75 : f32 to vector<8x32xf32>
    %257 = arith.addf %256, %255 : vector<8x32xf32>
    %258 = arith.divf %256, %257 : vector<8x32xf32>
    %259 = vector.extract_strided_slice %252 {offsets = [0, 32], sizes = [8, 32], strides = [1, 1]} : vector<8x128xf32> to vector<8x32xf32>
    %260 = arith.negf %259 : vector<8x32xf32>
    %261 = math.exp %260 : vector<8x32xf32>
    %cst_76 = arith.constant 1.000000e+00 : f32
    %262 = vector.broadcast %cst_76 : f32 to vector<8x32xf32>
    %263 = arith.addf %262, %261 : vector<8x32xf32>
    %264 = arith.divf %262, %263 : vector<8x32xf32>
    %265 = vector.extract_strided_slice %252 {offsets = [0, 64], sizes = [8, 32], strides = [1, 1]} : vector<8x128xf32> to vector<8x32xf32>
    %266 = math.tanh %265 : vector<8x32xf32>
    %267 = vector.extract_strided_slice %252 {offsets = [0, 96], sizes = [8, 32], strides = [1, 1]} : vector<8x128xf32> to vector<8x32xf32>
    %268 = arith.negf %267 : vector<8x32xf32>
    %269 = math.exp %268 : vector<8x32xf32>
    %cst_77 = arith.constant 1.000000e+00 : f32
    %270 = vector.broadcast %cst_77 : f32 to vector<8x32xf32>
    %271 = arith.addf %270, %269 : vector<8x32xf32>
    %272 = arith.divf %270, %271 : vector<8x32xf32>
    %273 = arith.mulf %264, %241 : vector<8x32xf32>
    %274 = arith.mulf %258, %266 : vector<8x32xf32>
    %275 = arith.addf %273, %274 : vector<8x32xf32>
    %276 = math.tanh %275 : vector<8x32xf32>
    %277 = arith.mulf %272, %276 : vector<8x32xf32>
    %278 = arith.index_cast %247 : i32 to index
    %c0_78 = arith.constant 0 : index
    %279 = vector.load %arg10[%278, %c0_78] : memref<64x32xf32, #tpu.memory_space<vmem>>, vector<8x32xf32>
    tpu.vector_store %arg10[%278, %c0_78], %277 {strides = array<i32>} : memref<64x32xf32, #tpu.memory_space<vmem>>, vector<8x32xf32>,
    %c8_i32_79 = arith.constant 8 : i32
    %c0_80 = arith.constant 0 : index
    %c0_81 = arith.constant 0 : index
    %280 = vector.load %arg10[%c0_80, %c0_81] : memref<64x32xf32, #tpu.memory_space<vmem>>, vector<64x32xf32>
    %c0_82 = arith.constant 0 : index
    %c0_83 = arith.constant 0 : index
    %281 = vector.load %arg4[%c0_82, %c0_83] : memref<32x128xf32, #tpu.memory_space<vmem>>, vector<32x128xf32>
    %cst_84 = arith.constant dense<0.000000e+00> : vector<64x128xf32>
    %282 = tpu.matmul %280, %281, %cst_84 {dimension_numbers = #tpu.dot_dimension_numbers<[1], [0], [0], [1], [0, 0, 1, 1], [], []>} : vector<64x32xf32>, vector<32x128xf32>, vector<64x128xf32> -> vector<64x128xf32>
    %c0_85 = arith.constant 0 : index
    %c0_86 = arith.constant 0 : index
    %283 = vector.load %arg6[%c0_85, %c0_86] : memref<1x128xf32, #tpu.memory_space<vmem>>, vector<1x128xf32>
    %284 = vector.broadcast %283 : vector<1x128xf32> to vector<64x128xf32>
    %285 = arith.addf %282, %284 : vector<64x128xf32>
    %c0_87 = arith.constant 0 : index
    %c0_88 = arith.constant 0 : index
    %286 = vector.load %arg9[%c0_87, %c0_88] : memref<64x128xf32, #tpu.memory_space<vmem>>, vector<64x128xf32>
    tpu.vector_store %arg9[%c0_87, %c0_88], %285 {strides = array<i32>} : memref<64x128xf32, #tpu.memory_space<vmem>>, vector<64x128xf32>,
    %c0_i32_89 = arith.constant 0 : i32
    %c8_i32_90 = arith.constant 8 : i32
    %287 = arith.muli %c0_i32_89, %c8_i32_90 : i32
    %288 = tpu.assume_multiple %287, 8 : i32
    %289 = arith.index_cast %288 : i32 to index
    %c0_91 = arith.constant 0 : index
    %290 = vector.load %arg9[%289, %c0_91] : memref<64x128xf32, #tpu.memory_space<vmem>>, vector<8x128xf32>
    %c0_92 = arith.constant 0 : index
    %c0_93 = arith.constant 0 : index
    %291 = vector.load %arg5[%c0_92, %c0_93] : memref<32x128xf32, #tpu.memory_space<vmem>>, vector<32x128xf32>
    %cst_94 = arith.constant dense<0.000000e+00> : vector<8x128xf32>
    %292 = tpu.matmul %7, %291, %cst_94 {dimension_numbers = #tpu.dot_dimension_numbers<[1], [0], [0], [1], [0, 0, 1, 1], [], []>} : vector<8x32xf32>, vector<32x128xf32>, vector<8x128xf32> -> vector<8x128xf32>
    %293 = arith.addf %290, %292 : vector<8x128xf32>
    %294 = vector.extract_strided_slice %293 {offsets = [0, 0], sizes = [8, 32], strides = [1, 1]} : vector<8x128xf32> to vector<8x32xf32>
    %295 = arith.negf %294 : vector<8x32xf32>
    %296 = math.exp %295 : vector<8x32xf32>
    %cst_95 = arith.constant 1.000000e+00 : f32
    %297 = vector.broadcast %cst_95 : f32 to vector<8x32xf32>
    %298 = arith.addf %297, %296 : vector<8x32xf32>
    %299 = arith.divf %297, %298 : vector<8x32xf32>
    %300 = vector.extract_strided_slice %293 {offsets = [0, 32], sizes = [8, 32], strides = [1, 1]} : vector<8x128xf32> to vector<8x32xf32>
    %301 = arith.negf %300 : vector<8x32xf32>
    %302 = math.exp %301 : vector<8x32xf32>
    %cst_96 = arith.constant 1.000000e+00 : f32
    %303 = vector.broadcast %cst_96 : f32 to vector<8x32xf32>
    %304 = arith.addf %303, %302 : vector<8x32xf32>
    %305 = arith.divf %303, %304 : vector<8x32xf32>
    %306 = vector.extract_strided_slice %293 {offsets = [0, 64], sizes = [8, 32], strides = [1, 1]} : vector<8x128xf32> to vector<8x32xf32>
    %307 = math.tanh %306 : vector<8x32xf32>
    %308 = vector.extract_strided_slice %293 {offsets = [0, 96], sizes = [8, 32], strides = [1, 1]} : vector<8x128xf32> to vector<8x32xf32>
    %309 = arith.negf %308 : vector<8x32xf32>
    %310 = math.exp %309 : vector<8x32xf32>
    %cst_97 = arith.constant 1.000000e+00 : f32
    %311 = vector.broadcast %cst_97 : f32 to vector<8x32xf32>
    %312 = arith.addf %311, %310 : vector<8x32xf32>
    %313 = arith.divf %311, %312 : vector<8x32xf32>
    %314 = arith.mulf %305, %7 : vector<8x32xf32>
    %315 = arith.mulf %299, %307 : vector<8x32xf32>
    %316 = arith.addf %314, %315 : vector<8x32xf32>
    %317 = math.tanh %316 : vector<8x32xf32>
    %318 = arith.mulf %313, %317 : vector<8x32xf32>
    %c1_i32_98 = arith.constant 1 : i32
    %c8_i32_99 = arith.constant 8 : i32
    %319 = arith.muli %c1_i32_98, %c8_i32_99 : i32
    %320 = tpu.assume_multiple %319, 8 : i32
    %321 = arith.index_cast %320 : i32 to index
    %c0_100 = arith.constant 0 : index
    %322 = vector.load %arg9[%321, %c0_100] : memref<64x128xf32, #tpu.memory_space<vmem>>, vector<8x128xf32>
    %c0_101 = arith.constant 0 : index
    %c0_102 = arith.constant 0 : index
    %323 = vector.load %arg5[%c0_101, %c0_102] : memref<32x128xf32, #tpu.memory_space<vmem>>, vector<32x128xf32>
    %cst_103 = arith.constant dense<0.000000e+00> : vector<8x128xf32>
    %324 = tpu.matmul %318, %323, %cst_103 {dimension_numbers = #tpu.dot_dimension_numbers<[1], [0], [0], [1], [0, 0, 1, 1], [], []>} : vector<8x32xf32>, vector<32x128xf32>, vector<8x128xf32> -> vector<8x128xf32>
    %325 = arith.addf %322, %324 : vector<8x128xf32>
    %326 = vector.extract_strided_slice %325 {offsets = [0, 0], sizes = [8, 32], strides = [1, 1]} : vector<8x128xf32> to vector<8x32xf32>
    %327 = arith.negf %326 : vector<8x32xf32>
    %328 = math.exp %327 : vector<8x32xf32>
    %cst_104 = arith.constant 1.000000e+00 : f32
    %329 = vector.broadcast %cst_104 : f32 to vector<8x32xf32>
    %330 = arith.addf %329, %328 : vector<8x32xf32>
    %331 = arith.divf %329, %330 : vector<8x32xf32>
    %332 = vector.extract_strided_slice %325 {offsets = [0, 32], sizes = [8, 32], strides = [1, 1]} : vector<8x128xf32> to vector<8x32xf32>
    %333 = arith.negf %332 : vector<8x32xf32>
    %334 = math.exp %333 : vector<8x32xf32>
    %cst_105 = arith.constant 1.000000e+00 : f32
    %335 = vector.broadcast %cst_105 : f32 to vector<8x32xf32>
    %336 = arith.addf %335, %334 : vector<8x32xf32>
    %337 = arith.divf %335, %336 : vector<8x32xf32>
    %338 = vector.extract_strided_slice %325 {offsets = [0, 64], sizes = [8, 32], strides = [1, 1]} : vector<8x128xf32> to vector<8x32xf32>
    %339 = math.tanh %338 : vector<8x32xf32>
    %340 = vector.extract_strided_slice %325 {offsets = [0, 96], sizes = [8, 32], strides = [1, 1]} : vector<8x128xf32> to vector<8x32xf32>
    %341 = arith.negf %340 : vector<8x32xf32>
    %342 = math.exp %341 : vector<8x32xf32>
    %cst_106 = arith.constant 1.000000e+00 : f32
    %343 = vector.broadcast %cst_106 : f32 to vector<8x32xf32>
    %344 = arith.addf %343, %342 : vector<8x32xf32>
    %345 = arith.divf %343, %344 : vector<8x32xf32>
    %346 = arith.mulf %337, %316 : vector<8x32xf32>
    %347 = arith.mulf %331, %339 : vector<8x32xf32>
    %348 = arith.addf %346, %347 : vector<8x32xf32>
    %349 = math.tanh %348 : vector<8x32xf32>
    %350 = arith.mulf %345, %349 : vector<8x32xf32>
    %c2_i32_107 = arith.constant 2 : i32
    %c8_i32_108 = arith.constant 8 : i32
    %351 = arith.muli %c2_i32_107, %c8_i32_108 : i32
    %352 = tpu.assume_multiple %351, 8 : i32
    %353 = arith.index_cast %352 : i32 to index
    %c0_109 = arith.constant 0 : index
    %354 = vector.load %arg9[%353, %c0_109] : memref<64x128xf32, #tpu.memory_space<vmem>>, vector<8x128xf32>
    %c0_110 = arith.constant 0 : index
    %c0_111 = arith.constant 0 : index
    %355 = vector.load %arg5[%c0_110, %c0_111] : memref<32x128xf32, #tpu.memory_space<vmem>>, vector<32x128xf32>
    %cst_112 = arith.constant dense<0.000000e+00> : vector<8x128xf32>
    %356 = tpu.matmul %350, %355, %cst_112 {dimension_numbers = #tpu.dot_dimension_numbers<[1], [0], [0], [1], [0, 0, 1, 1], [], []>} : vector<8x32xf32>, vector<32x128xf32>, vector<8x128xf32> -> vector<8x128xf32>
    %357 = arith.addf %354, %356 : vector<8x128xf32>
    %358 = vector.extract_strided_slice %357 {offsets = [0, 0], sizes = [8, 32], strides = [1, 1]} : vector<8x128xf32> to vector<8x32xf32>
    %359 = arith.negf %358 : vector<8x32xf32>
    %360 = math.exp %359 : vector<8x32xf32>
    %cst_113 = arith.constant 1.000000e+00 : f32
    %361 = vector.broadcast %cst_113 : f32 to vector<8x32xf32>
    %362 = arith.addf %361, %360 : vector<8x32xf32>
    %363 = arith.divf %361, %362 : vector<8x32xf32>
    %364 = vector.extract_strided_slice %357 {offsets = [0, 32], sizes = [8, 32], strides = [1, 1]} : vector<8x128xf32> to vector<8x32xf32>
    %365 = arith.negf %364 : vector<8x32xf32>
    %366 = math.exp %365 : vector<8x32xf32>
    %cst_114 = arith.constant 1.000000e+00 : f32
    %367 = vector.broadcast %cst_114 : f32 to vector<8x32xf32>
    %368 = arith.addf %367, %366 : vector<8x32xf32>
    %369 = arith.divf %367, %368 : vector<8x32xf32>
    %370 = vector.extract_strided_slice %357 {offsets = [0, 64], sizes = [8, 32], strides = [1, 1]} : vector<8x128xf32> to vector<8x32xf32>
    %371 = math.tanh %370 : vector<8x32xf32>
    %372 = vector.extract_strided_slice %357 {offsets = [0, 96], sizes = [8, 32], strides = [1, 1]} : vector<8x128xf32> to vector<8x32xf32>
    %373 = arith.negf %372 : vector<8x32xf32>
    %374 = math.exp %373 : vector<8x32xf32>
    %cst_115 = arith.constant 1.000000e+00 : f32
    %375 = vector.broadcast %cst_115 : f32 to vector<8x32xf32>
    %376 = arith.addf %375, %374 : vector<8x32xf32>
    %377 = arith.divf %375, %376 : vector<8x32xf32>
    %378 = arith.mulf %369, %348 : vector<8x32xf32>
    %379 = arith.mulf %363, %371 : vector<8x32xf32>
    %380 = arith.addf %378, %379 : vector<8x32xf32>
    %381 = math.tanh %380 : vector<8x32xf32>
    %382 = arith.mulf %377, %381 : vector<8x32xf32>
    %c3_i32_116 = arith.constant 3 : i32
    %c8_i32_117 = arith.constant 8 : i32
    %383 = arith.muli %c3_i32_116, %c8_i32_117 : i32
    %384 = tpu.assume_multiple %383, 8 : i32
    %385 = arith.index_cast %384 : i32 to index
    %c0_118 = arith.constant 0 : index
    %386 = vector.load %arg9[%385, %c0_118] : memref<64x128xf32, #tpu.memory_space<vmem>>, vector<8x128xf32>
    %c0_119 = arith.constant 0 : index
    %c0_120 = arith.constant 0 : index
    %387 = vector.load %arg5[%c0_119, %c0_120] : memref<32x128xf32, #tpu.memory_space<vmem>>, vector<32x128xf32>
    %cst_121 = arith.constant dense<0.000000e+00> : vector<8x128xf32>
    %388 = tpu.matmul %382, %387, %cst_121 {dimension_numbers = #tpu.dot_dimension_numbers<[1], [0], [0], [1], [0, 0, 1, 1], [], []>} : vector<8x32xf32>, vector<32x128xf32>, vector<8x128xf32> -> vector<8x128xf32>
    %389 = arith.addf %386, %388 : vector<8x128xf32>
    %390 = vector.extract_strided_slice %389 {offsets = [0, 0], sizes = [8, 32], strides = [1, 1]} : vector<8x128xf32> to vector<8x32xf32>
    %391 = arith.negf %390 : vector<8x32xf32>
    %392 = math.exp %391 : vector<8x32xf32>
    %cst_122 = arith.constant 1.000000e+00 : f32
    %393 = vector.broadcast %cst_122 : f32 to vector<8x32xf32>
    %394 = arith.addf %393, %392 : vector<8x32xf32>
    %395 = arith.divf %393, %394 : vector<8x32xf32>
    %396 = vector.extract_strided_slice %389 {offsets = [0, 32], sizes = [8, 32], strides = [1, 1]} : vector<8x128xf32> to vector<8x32xf32>
    %397 = arith.negf %396 : vector<8x32xf32>
    %398 = math.exp %397 : vector<8x32xf32>
    %cst_123 = arith.constant 1.000000e+00 : f32
    %399 = vector.broadcast %cst_123 : f32 to vector<8x32xf32>
    %400 = arith.addf %399, %398 : vector<8x32xf32>
    %401 = arith.divf %399, %400 : vector<8x32xf32>
    %402 = vector.extract_strided_slice %389 {offsets = [0, 64], sizes = [8, 32], strides = [1, 1]} : vector<8x128xf32> to vector<8x32xf32>
    %403 = math.tanh %402 : vector<8x32xf32>
    %404 = vector.extract_strided_slice %389 {offsets = [0, 96], sizes = [8, 32], strides = [1, 1]} : vector<8x128xf32> to vector<8x32xf32>
    %405 = arith.negf %404 : vector<8x32xf32>
    %406 = math.exp %405 : vector<8x32xf32>
    %cst_124 = arith.constant 1.000000e+00 : f32
    %407 = vector.broadcast %cst_124 : f32 to vector<8x32xf32>
    %408 = arith.addf %407, %406 : vector<8x32xf32>
    %409 = arith.divf %407, %408 : vector<8x32xf32>
    %410 = arith.mulf %401, %380 : vector<8x32xf32>
    %411 = arith.mulf %395, %403 : vector<8x32xf32>
    %412 = arith.addf %410, %411 : vector<8x32xf32>
    %413 = math.tanh %412 : vector<8x32xf32>
    %414 = arith.mulf %409, %413 : vector<8x32xf32>
    %c4_i32_125 = arith.constant 4 : i32
    %c8_i32_126 = arith.constant 8 : i32
    %415 = arith.muli %c4_i32_125, %c8_i32_126 : i32
    %416 = tpu.assume_multiple %415, 8 : i32
    %417 = arith.index_cast %416 : i32 to index
    %c0_127 = arith.constant 0 : index
    %418 = vector.load %arg9[%417, %c0_127] : memref<64x128xf32, #tpu.memory_space<vmem>>, vector<8x128xf32>
    %c0_128 = arith.constant 0 : index
    %c0_129 = arith.constant 0 : index
    %419 = vector.load %arg5[%c0_128, %c0_129] : memref<32x128xf32, #tpu.memory_space<vmem>>, vector<32x128xf32>
    %cst_130 = arith.constant dense<0.000000e+00> : vector<8x128xf32>
    %420 = tpu.matmul %414, %419, %cst_130 {dimension_numbers = #tpu.dot_dimension_numbers<[1], [0], [0], [1], [0, 0, 1, 1], [], []>} : vector<8x32xf32>, vector<32x128xf32>, vector<8x128xf32> -> vector<8x128xf32>
    %421 = arith.addf %418, %420 : vector<8x128xf32>
    %422 = vector.extract_strided_slice %421 {offsets = [0, 0], sizes = [8, 32], strides = [1, 1]} : vector<8x128xf32> to vector<8x32xf32>
    %423 = arith.negf %422 : vector<8x32xf32>
    %424 = math.exp %423 : vector<8x32xf32>
    %cst_131 = arith.constant 1.000000e+00 : f32
    %425 = vector.broadcast %cst_131 : f32 to vector<8x32xf32>
    %426 = arith.addf %425, %424 : vector<8x32xf32>
    %427 = arith.divf %425, %426 : vector<8x32xf32>
    %428 = vector.extract_strided_slice %421 {offsets = [0, 32], sizes = [8, 32], strides = [1, 1]} : vector<8x128xf32> to vector<8x32xf32>
    %429 = arith.negf %428 : vector<8x32xf32>
    %430 = math.exp %429 : vector<8x32xf32>
    %cst_132 = arith.constant 1.000000e+00 : f32
    %431 = vector.broadcast %cst_132 : f32 to vector<8x32xf32>
    %432 = arith.addf %431, %430 : vector<8x32xf32>
    %433 = arith.divf %431, %432 : vector<8x32xf32>
    %434 = vector.extract_strided_slice %421 {offsets = [0, 64], sizes = [8, 32], strides = [1, 1]} : vector<8x128xf32> to vector<8x32xf32>
    %435 = math.tanh %434 : vector<8x32xf32>
    %436 = vector.extract_strided_slice %421 {offsets = [0, 96], sizes = [8, 32], strides = [1, 1]} : vector<8x128xf32> to vector<8x32xf32>
    %437 = arith.negf %436 : vector<8x32xf32>
    %438 = math.exp %437 : vector<8x32xf32>
    %cst_133 = arith.constant 1.000000e+00 : f32
    %439 = vector.broadcast %cst_133 : f32 to vector<8x32xf32>
    %440 = arith.addf %439, %438 : vector<8x32xf32>
    %441 = arith.divf %439, %440 : vector<8x32xf32>
    %442 = arith.mulf %433, %412 : vector<8x32xf32>
    %443 = arith.mulf %427, %435 : vector<8x32xf32>
    %444 = arith.addf %442, %443 : vector<8x32xf32>
    %445 = math.tanh %444 : vector<8x32xf32>
    %446 = arith.mulf %441, %445 : vector<8x32xf32>
    %c5_i32_134 = arith.constant 5 : i32
    %c8_i32_135 = arith.constant 8 : i32
    %447 = arith.muli %c5_i32_134, %c8_i32_135 : i32
    %448 = tpu.assume_multiple %447, 8 : i32
    %449 = arith.index_cast %448 : i32 to index
    %c0_136 = arith.constant 0 : index
    %450 = vector.load %arg9[%449, %c0_136] : memref<64x128xf32, #tpu.memory_space<vmem>>, vector<8x128xf32>
    %c0_137 = arith.constant 0 : index
    %c0_138 = arith.constant 0 : index
    %451 = vector.load %arg5[%c0_137, %c0_138] : memref<32x128xf32, #tpu.memory_space<vmem>>, vector<32x128xf32>
    %cst_139 = arith.constant dense<0.000000e+00> : vector<8x128xf32>
    %452 = tpu.matmul %446, %451, %cst_139 {dimension_numbers = #tpu.dot_dimension_numbers<[1], [0], [0], [1], [0, 0, 1, 1], [], []>} : vector<8x32xf32>, vector<32x128xf32>, vector<8x128xf32> -> vector<8x128xf32>
    %453 = arith.addf %450, %452 : vector<8x128xf32>
    %454 = vector.extract_strided_slice %453 {offsets = [0, 0], sizes = [8, 32], strides = [1, 1]} : vector<8x128xf32> to vector<8x32xf32>
    %455 = arith.negf %454 : vector<8x32xf32>
    %456 = math.exp %455 : vector<8x32xf32>
    %cst_140 = arith.constant 1.000000e+00 : f32
    %457 = vector.broadcast %cst_140 : f32 to vector<8x32xf32>
    %458 = arith.addf %457, %456 : vector<8x32xf32>
    %459 = arith.divf %457, %458 : vector<8x32xf32>
    %460 = vector.extract_strided_slice %453 {offsets = [0, 32], sizes = [8, 32], strides = [1, 1]} : vector<8x128xf32> to vector<8x32xf32>
    %461 = arith.negf %460 : vector<8x32xf32>
    %462 = math.exp %461 : vector<8x32xf32>
    %cst_141 = arith.constant 1.000000e+00 : f32
    %463 = vector.broadcast %cst_141 : f32 to vector<8x32xf32>
    %464 = arith.addf %463, %462 : vector<8x32xf32>
    %465 = arith.divf %463, %464 : vector<8x32xf32>
    %466 = vector.extract_strided_slice %453 {offsets = [0, 64], sizes = [8, 32], strides = [1, 1]} : vector<8x128xf32> to vector<8x32xf32>
    %467 = math.tanh %466 : vector<8x32xf32>
    %468 = vector.extract_strided_slice %453 {offsets = [0, 96], sizes = [8, 32], strides = [1, 1]} : vector<8x128xf32> to vector<8x32xf32>
    %469 = arith.negf %468 : vector<8x32xf32>
    %470 = math.exp %469 : vector<8x32xf32>
    %cst_142 = arith.constant 1.000000e+00 : f32
    %471 = vector.broadcast %cst_142 : f32 to vector<8x32xf32>
    %472 = arith.addf %471, %470 : vector<8x32xf32>
    %473 = arith.divf %471, %472 : vector<8x32xf32>
    %474 = arith.mulf %465, %444 : vector<8x32xf32>
    %475 = arith.mulf %459, %467 : vector<8x32xf32>
    %476 = arith.addf %474, %475 : vector<8x32xf32>
    %477 = math.tanh %476 : vector<8x32xf32>
    %478 = arith.mulf %473, %477 : vector<8x32xf32>
    %c6_i32_143 = arith.constant 6 : i32
    %c8_i32_144 = arith.constant 8 : i32
    %479 = arith.muli %c6_i32_143, %c8_i32_144 : i32
    %480 = tpu.assume_multiple %479, 8 : i32
    %481 = arith.index_cast %480 : i32 to index
    %c0_145 = arith.constant 0 : index
    %482 = vector.load %arg9[%481, %c0_145] : memref<64x128xf32, #tpu.memory_space<vmem>>, vector<8x128xf32>
    %c0_146 = arith.constant 0 : index
    %c0_147 = arith.constant 0 : index
    %483 = vector.load %arg5[%c0_146, %c0_147] : memref<32x128xf32, #tpu.memory_space<vmem>>, vector<32x128xf32>
    %cst_148 = arith.constant dense<0.000000e+00> : vector<8x128xf32>
    %484 = tpu.matmul %478, %483, %cst_148 {dimension_numbers = #tpu.dot_dimension_numbers<[1], [0], [0], [1], [0, 0, 1, 1], [], []>} : vector<8x32xf32>, vector<32x128xf32>, vector<8x128xf32> -> vector<8x128xf32>
    %485 = arith.addf %482, %484 : vector<8x128xf32>
    %486 = vector.extract_strided_slice %485 {offsets = [0, 0], sizes = [8, 32], strides = [1, 1]} : vector<8x128xf32> to vector<8x32xf32>
    %487 = arith.negf %486 : vector<8x32xf32>
    %488 = math.exp %487 : vector<8x32xf32>
    %cst_149 = arith.constant 1.000000e+00 : f32
    %489 = vector.broadcast %cst_149 : f32 to vector<8x32xf32>
    %490 = arith.addf %489, %488 : vector<8x32xf32>
    %491 = arith.divf %489, %490 : vector<8x32xf32>
    %492 = vector.extract_strided_slice %485 {offsets = [0, 32], sizes = [8, 32], strides = [1, 1]} : vector<8x128xf32> to vector<8x32xf32>
    %493 = arith.negf %492 : vector<8x32xf32>
    %494 = math.exp %493 : vector<8x32xf32>
    %cst_150 = arith.constant 1.000000e+00 : f32
    %495 = vector.broadcast %cst_150 : f32 to vector<8x32xf32>
    %496 = arith.addf %495, %494 : vector<8x32xf32>
    %497 = arith.divf %495, %496 : vector<8x32xf32>
    %498 = vector.extract_strided_slice %485 {offsets = [0, 64], sizes = [8, 32], strides = [1, 1]} : vector<8x128xf32> to vector<8x32xf32>
    %499 = math.tanh %498 : vector<8x32xf32>
    %500 = vector.extract_strided_slice %485 {offsets = [0, 96], sizes = [8, 32], strides = [1, 1]} : vector<8x128xf32> to vector<8x32xf32>
    %501 = arith.negf %500 : vector<8x32xf32>
    %502 = math.exp %501 : vector<8x32xf32>
    %cst_151 = arith.constant 1.000000e+00 : f32
    %503 = vector.broadcast %cst_151 : f32 to vector<8x32xf32>
    %504 = arith.addf %503, %502 : vector<8x32xf32>
    %505 = arith.divf %503, %504 : vector<8x32xf32>
    %506 = arith.mulf %497, %476 : vector<8x32xf32>
    %507 = arith.mulf %491, %499 : vector<8x32xf32>
    %508 = arith.addf %506, %507 : vector<8x32xf32>
    %509 = math.tanh %508 : vector<8x32xf32>
    %510 = arith.mulf %505, %509 : vector<8x32xf32>
    %c7_i32_152 = arith.constant 7 : i32
    %c8_i32_153 = arith.constant 8 : i32
    %511 = arith.muli %c7_i32_152, %c8_i32_153 : i32
    %512 = tpu.assume_multiple %511, 8 : i32
    %513 = arith.index_cast %512 : i32 to index
    %c0_154 = arith.constant 0 : index
    %514 = vector.load %arg9[%513, %c0_154] : memref<64x128xf32, #tpu.memory_space<vmem>>, vector<8x128xf32>
    %c0_155 = arith.constant 0 : index
    %c0_156 = arith.constant 0 : index
    %515 = vector.load %arg5[%c0_155, %c0_156] : memref<32x128xf32, #tpu.memory_space<vmem>>, vector<32x128xf32>
    %cst_157 = arith.constant dense<0.000000e+00> : vector<8x128xf32>
    %516 = tpu.matmul %510, %515, %cst_157 {dimension_numbers = #tpu.dot_dimension_numbers<[1], [0], [0], [1], [0, 0, 1, 1], [], []>} : vector<8x32xf32>, vector<32x128xf32>, vector<8x128xf32> -> vector<8x128xf32>
    %517 = arith.addf %514, %516 : vector<8x128xf32>
    %518 = vector.extract_strided_slice %517 {offsets = [0, 0], sizes = [8, 32], strides = [1, 1]} : vector<8x128xf32> to vector<8x32xf32>
    %519 = arith.negf %518 : vector<8x32xf32>
    %520 = math.exp %519 : vector<8x32xf32>
    %cst_158 = arith.constant 1.000000e+00 : f32
    %521 = vector.broadcast %cst_158 : f32 to vector<8x32xf32>
    %522 = arith.addf %521, %520 : vector<8x32xf32>
    %523 = arith.divf %521, %522 : vector<8x32xf32>
    %524 = vector.extract_strided_slice %517 {offsets = [0, 32], sizes = [8, 32], strides = [1, 1]} : vector<8x128xf32> to vector<8x32xf32>
    %525 = arith.negf %524 : vector<8x32xf32>
    %526 = math.exp %525 : vector<8x32xf32>
    %cst_159 = arith.constant 1.000000e+00 : f32
    %527 = vector.broadcast %cst_159 : f32 to vector<8x32xf32>
    %528 = arith.addf %527, %526 : vector<8x32xf32>
    %529 = arith.divf %527, %528 : vector<8x32xf32>
    %530 = vector.extract_strided_slice %517 {offsets = [0, 64], sizes = [8, 32], strides = [1, 1]} : vector<8x128xf32> to vector<8x32xf32>
    %531 = math.tanh %530 : vector<8x32xf32>
    %532 = vector.extract_strided_slice %517 {offsets = [0, 96], sizes = [8, 32], strides = [1, 1]} : vector<8x128xf32> to vector<8x32xf32>
    %533 = arith.negf %532 : vector<8x32xf32>
    %534 = math.exp %533 : vector<8x32xf32>
    %cst_160 = arith.constant 1.000000e+00 : f32
    %535 = vector.broadcast %cst_160 : f32 to vector<8x32xf32>
    %536 = arith.addf %535, %534 : vector<8x32xf32>
    %537 = arith.divf %535, %536 : vector<8x32xf32>
    %538 = arith.mulf %529, %508 : vector<8x32xf32>
    %539 = arith.mulf %523, %531 : vector<8x32xf32>
    %540 = arith.addf %538, %539 : vector<8x32xf32>
    %541 = math.tanh %540 : vector<8x32xf32>
    %542 = arith.mulf %537, %541 : vector<8x32xf32>
    %c8_i32_161 = arith.constant 8 : i32
    %c0_162 = arith.constant 0 : index
    %c0_163 = arith.constant 0 : index
    %c0_164 = arith.constant 0 : index
    %543 = vector.load %arg7[%c0_162, %c0_163, %c0_164] : memref<2x8x32xf32, #tpu.memory_space<vmem>>, vector<1x8x32xf32>
    %544 = vector.shape_cast %543 : vector<1x8x32xf32> to vector<8x32xf32>
    %545 = vector.shape_cast %277 : vector<8x32xf32> to vector<1x8x32xf32>
    tpu.vector_store %arg7[%c0_162, %c0_163, %c0_164], %545 {strides = array<i32>} : memref<2x8x32xf32, #tpu.memory_space<vmem>>, vector<1x8x32xf32>,
    %c1 = arith.constant 1 : index
    %c0_165 = arith.constant 0 : index
    %c0_166 = arith.constant 0 : index
    %546 = vector.load %arg7[%c1, %c0_165, %c0_166] : memref<2x8x32xf32, #tpu.memory_space<vmem>>, vector<1x8x32xf32>
    %547 = vector.shape_cast %546 : vector<1x8x32xf32> to vector<8x32xf32>
    %548 = vector.shape_cast %542 : vector<8x32xf32> to vector<1x8x32xf32>
    tpu.vector_store %arg7[%c1, %c0_165, %c0_166], %548 {strides = array<i32>} : memref<2x8x32xf32, #tpu.memory_space<vmem>>, vector<1x8x32xf32>,
    %c0_167 = arith.constant 0 : index
    %c0_168 = arith.constant 0 : index
    %c0_169 = arith.constant 0 : index
    %549 = vector.load %arg8[%c0_167, %c0_168, %c0_169] : memref<2x8x32xf32, #tpu.memory_space<vmem>>, vector<1x8x32xf32>
    %550 = vector.shape_cast %549 : vector<1x8x32xf32> to vector<8x32xf32>
    %551 = vector.shape_cast %275 : vector<8x32xf32> to vector<1x8x32xf32>
    tpu.vector_store %arg8[%c0_167, %c0_168, %c0_169], %551 {strides = array<i32>} : memref<2x8x32xf32, #tpu.memory_space<vmem>>, vector<1x8x32xf32>,
    %c1_170 = arith.constant 1 : index
    %c0_171 = arith.constant 0 : index
    %c0_172 = arith.constant 0 : index
    %552 = vector.load %arg8[%c1_170, %c0_171, %c0_172] : memref<2x8x32xf32, #tpu.memory_space<vmem>>, vector<1x8x32xf32>
    %553 = vector.shape_cast %552 : vector<1x8x32xf32> to vector<8x32xf32>
    %554 = vector.shape_cast %540 : vector<8x32xf32> to vector<1x8x32xf32>
    tpu.vector_store %arg8[%c1_170, %c0_171, %c0_172], %554 {strides = array<i32>} : memref<2x8x32xf32, #tpu.memory_space<vmem>>, vector<1x8x32xf32>,
    return
  }
}

</mosaic_0001>

<bundles_post_ra>
// kernel: tpu_custom_call.1
= control target key start
LH: loop header
LB: loop body
LE: loop exit
PB: predicated region body
PF: predicated region fallthrough
CT: control target
= control target key end

     0   :  { %14 = vsyncpa [#allocation5], 0  ;;  %s3206_s0 = inlined_call_operand.vmem [shape: f32[64,16], index: 0, kind: input, shape index: {}]   ;;  %s3207_s1 = inlined_call_operand.hbm [shape: f32[16,128], index: 1, kind: input, shape index: {}]   ;;  %s3208_s2 = inlined_call_operand.vmem [shape: f32[32,128], index: 2, kind: input, shape index: {}]   ;;  %s3209_s3 = inlined_call_operand.vmem [shape: f32[1,128], index: 3, kind: input, shape index: {}]   ;;  %s3210_s4 = inlined_call_operand.vmem [shape: f32[32,128], index: 4, kind: input, shape index: {}]   ;;  %s3211_s5 = inlined_call_operand.vmem [shape: f32[32,128], index: 5, kind: input, shape index: {}]   ;;  %s3212_s6 = inlined_call_operand.vmem [shape: f32[1,128], index: 6, kind: input, shape index: {}]   ;;  %s3213_s7 = inlined_call_operand.hbm [shape: f32[2,8,32], index: 7, kind: output, shape index: {0}]   ;;  %s3214_s8 = inlined_call_operand.hbm [shape: f32[2,8,32], index: 8, kind: output, shape index: {1}]  }
   0x1   :  { %15 = vsyncpa [#allocation6], 0 }
   0x2   :  { %16 = vsyncpa [#allocation9], 0  ;;  %s2766_s27 = smov [#allocation4]   ;;  %s2694_s9 = scalar_lea.hbm %s3207_s1, 256 }
   0x3   :  { %s24_s28 = sshll.u32 %s2766_s27, 4  ;;  %p2695_p0 = scmp.ne.s32.totalorder %s3207_s1, %s2694_s9  ;;  %s25_s28 = int_to_ptr.vmem [resolvable:$true] %s24_s28 }
   0x4   :  { %p2698_p1 = scmp.lt.u32.totalorder %s2694_s9, %s3207_s1 }
   0x6   :  { %p2700_p2 = pnand %p2698_p1, %p2695_p0 }
   0x8   :  { %2703 = shalt.err (!%p2700_p2)
}
   0x9   :  { %s2704_s14 = scalar_lea.vmem %s25_s28, 256  ;;  %p2709_p4 = scmp.lt.s32.totalorder %s25_s28, %s25_s28 }
   0xa   :  { %p2705_p3 = scmp.ne.s32.totalorder %s25_s28, %s2704_s14  ;;  %p2710_p5 = scmp.lt.s32.totalorder %s2704_s14, %s2704_s14 }
   0xc   :  { %p2711_p6 = por %p2710_p5, %p2709_p4 }
   0xe   :  { %p2712_p7 = pnand %p2711_p6, %p2705_p3 }
  0x10   :  { %2715 = shalt.err (!%p2712_p7)
}
  0x11   :  { %s2767_s15 = smov 128   ;;  %s2768_s16 = smov 8  }
  0x12   :  { %30 = dma.hbm_to_vmem [thread:$0]  %s3207_s1, 256, %s25_s28, [#allocation5], %s2767_s15, %s2767_s15, %s2768_s16  }
  0x13   :  { %2760 = dma.done.wait [#allocation5], 256  }
  0x14   :  { %2761 = vsyncadd [#allocation5], 4294967040  ;;  %v2769_v0 = vmov 0.0|0.0   ;;  %vm2770_vm0 = vmmov 0   ;;  %v2771_v1 = vmov 0.0   ;;  %vm61_vm1 = vcmask 130048  }
  0x15   :  { %2451 = vmatprep.subr.bf16.mxu1 %v2769_v0  ;;  %2259 = vmatprep.mubr.msk.f32.mxu1 %vm2770_vm0, %v2771_v1  ;;  %v52_v2 = vld [vmem:[#allocation4] sm:$0xff]  ;;  %v53_v3 = vld [vmem:[#allocation4 + $0x8] sm:$0xff]  ;;  %v202_v9 = vld [vmem:[%s3208_s2 + $0x10] sm:$0xff]  ;;  %s2772_s9 = smov 64   ;;  %vm204_vm2 = vcmask 261120   ;;  %s2775_s18 = smov [#allocation7]  }
  0x16   :  { %v200_v4 = vld [vmem:[%s3208_s2] sm:$0xff]  ;;  %v2447_v5 = vpack.c.bf16 %v53_v3, %v52_v2  ;;  %v201_v6 = vld [vmem:[%s3208_s2 + $0x8] sm:$0xff]  ;;  %v203_v10 = vld [vmem:[%s3208_s2 + $0x18] sm:$0xff]  ;;  %s2057_s19 = sshll.u32 %s2775_s18, 4  ;;  %s2776_s20 = smov [#allocation8]   ;;  %s2058_s19 = int_to_ptr.vmem [resolvable:$true] %s2057_s19 }
  0x17   :  { %v44_v7 = vld [vmem:[%s3206_s0] sm:$0xff]  ;;  %v2849_v8 = vpack.c.bf16 %v201_v6, %v200_v4  ;;  %v45_v11 = vld [vmem:[%s3206_s0 + $0x8] sm:$0xff]  ;;  %v2862_v12 = vpack.c.bf16 %v203_v10, %v202_v9  ;;  %v46_v48 = vld [vmem:[%s3206_s0 + $0x10] sm:$0xff]  ;;  %s2069_s21 = sshll.u32 %s2776_s20, 4  ;;  %p2721_p9 = scmp.lt.s32.totalorder %s2058_s19, %s2058_s19  ;;  %s2070_s21 = int_to_ptr.vmem [resolvable:$true] %s2069_s21 }
  0x18   :  { %2239 = vmatprep.mubr.msk.f32.mxu0 %vm61_vm1, %v44_v7  ;;  %2448 = vmatprep.subr.bf16.mxu0 %v2447_v5  ;;  %v2883_v13 = vld [vmem:[%s3209_s3] ss:$0 sm:$0xff]  ;;  %s2773_s3 = smov 32   ;;  %v47_v49 = vld [vmem:[%s3206_s0 + $0x18] sm:$0xff]  ;;  %v49_v51 = vld [vmem:[%s3206_s0 + $0x28] sm:$0xff] }
  0x19   :  { %2453 = vmatpush3.bf16.msra.mxu1 %v2849_v8  ;;  %2450 = vmatpush3.bf16.msra.mxu0 %v2447_v5  ;;  %v48_v50 = vld [vmem:[%s3206_s0 + $0x20] sm:$0xff]  ;;  %v50_v52 = vld [vmem:[%s3206_s0 + $0x30] sm:$0xff]  ;;  %v51_v53 = vld [vmem:[%s3206_s0 + $0x38] sm:$0xff] }
  0x1a   :  { %2454 = vmatprep.subr.bf16.mxu1 %v2769_v0  ;;  %2463 = vmatprep.subr.bf16.mxu0 %v2769_v0 }
  0x1c   :  { %2240 = vmatmul.mubr.msk.f32.vlgmr.msra.gmra.mrb[0].mxu0 %vm61_vm1, %v45_v11 }
  0x1d   :  { %2456 = vmatpush3.bf16.msra.mxu1 %v2862_v12  ;;  %2465 = vmatpush3.bf16.msra.mxu0 %v2849_v8 }
  0x1e   :  { %2457 = vmatprep.subr.bf16.mxu1 %v2769_v0  ;;  %2466 = vmatprep.subr.bf16.mxu0 %v2769_v0 }
  0x1f   :  { %2242 = vmatprep.mubr.msk.f32.mxu0 %vm61_vm1, %v46_v48 }
  0x20   :  { %2260 = vmatmul.mubr.f32.vlgmr.msra.gmra.mrb[0].mxu1 %v2771_v1  ;;  %2243 = vmatmul.mubr.msk.f32.gmra.mrb[2].mxu0 %vm61_vm1, %v47_v49 }
  0x21   :  { %2459 = vmatpush3.bf16.msra.mxu1 %v2849_v8  ;;  %2270 = vmatprep.mubr.msk.f32.mxu1 %vm2770_vm0, %v2771_v1 }
  0x22   :  { %2460 = vmatprep.subr.bf16.mxu1 %v2769_v0  ;;  %2468 = vmatpush3.bf16.msra.mxu0 %v2862_v12 }
  0x23   :  { %2475 = vmatprep.subr.bf16.mxu0 %v2769_v0  ;;  %2245 = vmatprep.mubr.msk.f32.mxu0 %vm61_vm1, %v48_v50 }
  0x24   :  { %2246 = vmatmul.mubr.msk.f32.gmra.mrb[4].mxu0 %vm61_vm1, %v49_v51 }
  0x25   :  { %2462 = vmatpush3.bf16.msra.mxu1 %v2862_v12  ;;  %2248 = vmatprep.mubr.msk.f32.mxu0 %vm61_vm1, %v50_v52 }
  0x26   :  { %2469 = vmatprep.subr.bf16.mxu1 %v2769_v0 }
  0x28   :  { %2249 = vmatmul.mubr.msk.f32.gmra.mrb[6].mxu0 %vm61_vm1, %v51_v53 }
  0x29   :  { %2281 = vmatprep.mubr.msk.f32.mxu0 %vm2770_vm0, %v2771_v1 }
  0xef   :  { %v2241_v14 = vpop.f32.mrb[0].mxu0 }
  0xf0   :  { %v152_v15 = vpop.f32.mrb[1].mxu0  ;;  %v158_v34 = vadd.f32 %v2241_v14, %v2883_v13 }
  0xf1   :  { %v153_v16 = vadd.f32 %v2883_v13, %v152_v15 }
  0xf3   :  { %v274_v17 = vpop.f32.mrb[0].mxu1  ;;  %v2244_v57 = vpop.f32.mrb[2].mxu0 }
  0xf4   :  { %v278_v18 = vadd.f32 %v274_v17, %v153_v16  ;;  %v2261_v19 = vpop.f32.mrb[1].mxu1  ;;  %v162_v58 = vpop.f32.mrb[3].mxu0 }
  0xf5   :  { %v163_v2 = vadd.f32 %v2883_v13, %v162_v58 }
  0xf6   :  { %2566 = vtanh.f32 %v278_v18  ;;  %v2094_v21 = vmul.f32 -1.442695, %v278_v18 }
  0xf7   :  { %v2929_v59 = vpop.f32.mrb[4].mxu0 }
  0xf8   :  { %2568 = vpow2.f32 %v2094_v21  ;;  %v2931_v60 = vpop.f32.mrb[5].mxu0 }
  0xfb   :  { %v2933_v61 = vpop.f32.mrb[6].mxu0 }
  0xfc   :  { %v2935_v62 = vpop.f32.mrb[7].mxu0 }
 0x100   :  { %v2567_v20 = vpop.eup %2566 }
 0x101   :  { %288 = vrot.lane.b32.xlu0 %v2567_v20, %s2772_s9 }
 0x102   :  { %v2569_v22 = vpop.eup %2568 }
 0x103   :  { %v282_v23 = vadd.f32 1.0, %v2569_v22 }
 0x105   :  { %2570 = vrcp.f32 %v282_v23  ;;  %v168_v23 = vadd.f32 %v2244_v57, %v2883_v13 }
 0x10f   :  { %v2571_v24 = vpop.eup %2570 }
 0x110   :  { %v286_v27 = vmul.f32 0.0, %v2571_v24 }
 0x173   :  { %v289_v25 = vpop.permute.xlu0 %288 }
 0x174   :  { %v291_v26 = vmul.f32 %v2571_v24, %v289_v25 }
 0x176   :  { %293 = vrot.lane.b32.xlu0 %v291_v26, %s2773_s3 }
 0x1e8   :  { %v294_v28 = vpop.permute.xlu0 %293 }
 0x1e9   :  { %v296_v29 = vadd.f32 %v294_v28, %v286_v27 }
 0x1eb   :  { %2572 = vtanh.f32 %v296_v29 }
 0x1f5   :  { %v2573_v30 = vpop.eup %2572 }
 0x1f6   :  { %299 = vrot.lane.b32.xlu1 %v2573_v30, %s2772_s9 }
 0x268   :  { %v300_v31 = vpop.permute.xlu1 %299 }
 0x269   :  { %v302_v32 = vmul.f32 %v2571_v24, %v300_v31 }
 0x26b   :  { %304 = vrot.lane.b32.xlu1 %v302_v32, %s2773_s3 }
 0x2dd   :  { %v305_v33 = vpop.permute.xlu1 %304 }
 0x2de   :  { %307 = vst.msk [vmem:[#allocation3] sm:$0xff] %vm204_vm2, %v305_v33  ;;  %2271 = vmatmul.mubr.msk.f32.vlgmr.msra.gmra.mrb[2].mxu1 %vm204_vm2, %v305_v33 }
 0x2df   :  { %2471 = vmatpush3.bf16.msra.mxu1 %v2849_v8  ;;  %2292 = vmatprep.mubr.msk.f32.mxu1 %vm2770_vm0, %v2771_v1 }
 0x2e0   :  { %2472 = vmatprep.subr.bf16.mxu1 %v2769_v0 }
 0x2e3   :  { %2474 = vmatpush3.bf16.msra.mxu1 %v2862_v12 }
 0x2e4   :  { %2481 = vmatprep.subr.bf16.mxu1 %v2769_v0 }
 0x3b1   :  { %v382_v35 = vpop.f32.mrb[2].mxu1 }
 0x3b2   :  { %v386_v36 = vadd.f32 %v382_v35, %v158_v34  ;;  %v2272_v37 = vpop.f32.mrb[3].mxu1 }
 0x3b4   :  { %2574 = vtanh.f32 %v386_v36  ;;  %v2096_v39 = vmul.f32 -1.442695, %v386_v36 }
 0x3b6   :  { %2576 = vpow2.f32 %v2096_v39 }
 0x3be   :  { %v2575_v38 = vpop.eup %2574 }
 0x3bf   :  { %396 = vrot.lane.b32.xlu0 %v2575_v38, %s2772_s9 }
 0x3c0   :  { %v2577_v40 = vpop.eup %2576 }
 0x3c1   :  { %v390_v41 = vadd.f32 1.0, %v2577_v40 }
 0x3c3   :  { %2578 = vrcp.f32 %v390_v41  ;;  %v173_v41 = vadd.f32 %v2883_v13, %v2931_v60  ;;  %v178_v60 = vadd.f32 %v2929_v59, %v2883_v13 }
 0x3cd   :  { %v2579_v42 = vpop.eup %2578 }
 0x3ce   :  { %v394_v45 = vmul.f32 %v2579_v42, %v296_v29 }
 0x431   :  { %v397_v43 = vpop.permute.xlu0 %396 }
 0x432   :  { %v399_v44 = vmul.f32 %v2579_v42, %v397_v43 }
 0x434   :  { %401 = vrot.lane.b32.xlu1 %v399_v44, %s2773_s3 }
 0x4a6   :  { %v402_v46 = vpop.permute.xlu1 %401 }
 0x4a7   :  { %v404_v47 = vadd.f32 %v402_v46, %v394_v45 }
 0x4a9   :  { %2580 = vtanh.f32 %v404_v47 }
 0x4b3   :  { %v2581_v54 = vpop.eup %2580 }
 0x4b4   :  { %407 = vrot.lane.b32.xlu0 %v2581_v54, %s2772_s9 }
 0x526   :  { %v408_v55 = vpop.permute.xlu0 %407 }
 0x527   :  { %v410_v56 = vmul.f32 %v2579_v42, %v408_v55 }
 0x529   :  { %412 = vrot.lane.b32.xlu1 %v410_v56, %s2773_s3 }
 0x59b   :  { %v413_v63 = vpop.permute.xlu1 %412 }
 0x59c   :  { %416 = vst.msk [vmem:[#allocation3 + $0x8] sm:$0xff] %vm204_vm2, %v413_v63  ;;  %2282 = vmatmul.mubr.msk.f32.vlgmr.msra.gmra.mrb[8].mxu0 %vm204_vm2, %v413_v63 }
 0x59d   :  { %2477 = vmatpush3.bf16.msra.mxu0 %v2849_v8  ;;  %2303 = vmatprep.mubr.msk.f32.mxu0 %vm2770_vm0, %v2771_v1 }
 0x59e   :  { %2478 = vmatprep.subr.bf16.mxu0 %v2769_v0 }
 0x5a1   :  { %2480 = vmatpush3.bf16.msra.mxu0 %v2862_v12 }
 0x5a2   :  { %2487 = vmatprep.subr.bf16.mxu0 %v2769_v0 }
 0x66f   :  { %v491_v3 = vpop.f32.mrb[8].mxu0 }
 0x670   :  { %v495_v4 = vadd.f32 %v491_v3, %v163_v2  ;;  %v2283_v5 = vpop.f32.mrb[9].mxu0 }
 0x672   :  { %2582 = vtanh.f32 %v495_v4  ;;  %v2098_v7 = vmul.f32 -1.442695, %v495_v4 }
 0x674   :  { %2584 = vpow2.f32 %v2098_v7 }
 0x67c   :  { %v2583_v6 = vpop.eup %2582 }
 0x67d   :  { %505 = vrot.lane.b32.xlu0 %v2583_v6, %s2772_s9 }
 0x67e   :  { %v2585_v9 = vpop.eup %2584 }
 0x67f   :  { %v499_v10 = vadd.f32 1.0, %v2585_v9 }
 0x681   :  { %2586 = vrcp.f32 %v499_v10 }
 0x68b   :  { %v2587_v11 = vpop.eup %2586 }
 0x68c   :  { %v503_v16 = vmul.f32 %v2587_v11, %v404_v47 }
 0x6ef   :  { %v506_v14 = vpop.permute.xlu0 %505 }
 0x6f0   :  { %v508_v15 = vmul.f32 %v2587_v11, %v506_v14  ;;  %v1079_v14 = vld [vmem:[%s3210_s4] sm:$0xff] }
 0x6f2   :  { %510 = vrot.lane.b32.xlu1 %v508_v15, %s2773_s3  ;;  %v1080_v15 = vld [vmem:[%s3210_s4 + $0x8] sm:$0xff] }
 0x764   :  { %v511_v17 = vpop.permute.xlu1 %510 }
 0x765   :  { %v513_v18 = vadd.f32 %v511_v17, %v503_v16  ;;  %v2499_v16 = vpack.c.bf16 %v1080_v15, %v1079_v14 }
 0x767   :  { %2588 = vtanh.f32 %v513_v18 }
 0x771   :  { %v2589_v19 = vpop.eup %2588 }
 0x772   :  { %516 = vrot.lane.b32.xlu0 %v2589_v19, %s2772_s9 }
 0x7e4   :  { %v517_v20 = vpop.permute.xlu0 %516 }
 0x7e5   :  { %v519_v21 = vmul.f32 %v2587_v11, %v517_v20  ;;  %v1081_v20 = vld [vmem:[%s3210_s4 + $0x10] sm:$0xff] }
 0x7e7   :  { %521 = vrot.lane.b32.xlu1 %v519_v21, %s2773_s3  ;;  %v1082_v21 = vld [vmem:[%s3210_s4 + $0x18] sm:$0xff] }
 0x859   :  { %v522_v22 = vpop.permute.xlu1 %521 }
 0x85a   :  { %525 = vst.msk [vmem:[#allocation3 + $0x10] sm:$0xff] %vm204_vm2, %v522_v22  ;;  %2293 = vmatmul.mubr.msk.f32.vlgmr.msra.gmra.mrb[4].mxu1 %vm204_vm2, %v522_v22  ;;  %v2503_v22 = vpack.c.bf16 %v1082_v21, %v1081_v20 }
 0x85b   :  { %2483 = vmatpush3.bf16.msra.mxu1 %v2849_v8  ;;  %2314 = vmatprep.mubr.msk.f32.mxu1 %vm2770_vm0, %v2771_v1 }
 0x85c   :  { %2484 = vmatprep.subr.bf16.mxu1 %v2769_v0 }
 0x85f   :  { %2486 = vmatpush3.bf16.msra.mxu1 %v2862_v12 }
 0x860   :  { %2493 = vmatprep.subr.bf16.mxu1 %v2769_v0 }
 0x92d   :  { %v600_v24 = vpop.f32.mrb[4].mxu1 }
 0x92e   :  { %v604_v25 = vadd.f32 %v600_v24, %v168_v23  ;;  %v2294_v26 = vpop.f32.mrb[5].mxu1  ;;  %v1071_v24 = vld [vmem:[#allocation3] sm:$0xff] }
 0x92f   :  { %v1073_v26 = vld [vmem:[#allocation3 + $0x10] sm:$0xff] }
 0x930   :  { %2590 = vtanh.f32 %v604_v25  ;;  %v2100_v28 = vmul.f32 -1.442695, %v604_v25  ;;  %v1072_v25 = vld [vmem:[#allocation3 + $0x8] sm:$0xff] }
 0x932   :  { %2592 = vpow2.f32 %v2100_v28 }
 0x93a   :  { %v2591_v27 = vpop.eup %2590 }
 0x93b   :  { %614 = vrot.lane.b32.xlu0 %v2591_v27, %s2772_s9 }
 0x93c   :  { %v2593_v29 = vpop.eup %2592 }
 0x93d   :  { %v608_v30 = vadd.f32 1.0, %v2593_v29 }
 0x93f   :  { %2594 = vrcp.f32 %v608_v30  ;;  %v183_v30 = vadd.f32 %v2883_v13, %v2935_v62 }
 0x949   :  { %v2595_v31 = vpop.eup %2594 }
 0x94a   :  { %v612_v34 = vmul.f32 %v2595_v31, %v513_v18 }
 0x9ad   :  { %v615_v32 = vpop.permute.xlu0 %614 }
 0x9ae   :  { %v617_v33 = vmul.f32 %v2595_v31, %v615_v32 }
 0x9b0   :  { %619 = vrot.lane.b32.xlu1 %v617_v33, %s2773_s3 }
 0xa22   :  { %v620_v35 = vpop.permute.xlu1 %619 }
 0xa23   :  { %v622_v36 = vadd.f32 %v620_v35, %v612_v34 }
 0xa25   :  { %2596 = vtanh.f32 %v622_v36 }
 0xa2f   :  { %v2597_v37 = vpop.eup %2596 }
 0xa30   :  { %625 = vrot.lane.b32.xlu0 %v2597_v37, %s2772_s9 }
 0xaa2   :  { %v626_v38 = vpop.permute.xlu0 %625 }
 0xaa3   :  { %v628_v39 = vmul.f32 %v2595_v31, %v626_v38 }
 0xaa5   :  { %630 = vrot.lane.b32.xlu1 %v628_v39, %s2773_s3 }
 0xb17   :  { %v631_v40 = vpop.permute.xlu1 %630 }
 0xb18   :  { %634 = vst.msk [vmem:[#allocation3 + $0x18] sm:$0xff] %vm204_vm2, %v631_v40  ;;  %2304 = vmatmul.mubr.msk.f32.vlgmr.msra.gmra.mrb[10].mxu0 %vm204_vm2, %v631_v40 }
 0xb19   :  { %2489 = vmatpush3.bf16.msra.mxu0 %v2849_v8  ;;  %2325 = vmatprep.mubr.msk.f32.mxu0 %vm2770_vm0, %v2771_v1 }
 0xb1a   :  { %2490 = vmatprep.subr.bf16.mxu0 %v2769_v0 }
 0xb1d   :  { %2492 = vmatpush3.bf16.msra.mxu0 %v2862_v12 }
 0xb1e   :  { %2500 = vmatprep.subr.bf16.mxu0 %v2499_v16 }
 0xb1f   :  { %v1074_v27 = vld [vmem:[#allocation3 + $0x18] sm:$0xff] }
 0xbeb   :  { %v709_v42 = vpop.f32.mrb[10].mxu0 }
 0xbec   :  { %v713_v43 = vadd.f32 %v709_v42, %v173_v41  ;;  %v2305_v44 = vpop.f32.mrb[11].mxu0 }
 0xbee   :  { %2598 = vtanh.f32 %v713_v43  ;;  %v2102_v46 = vmul.f32 -1.442695, %v713_v43 }
 0xbf0   :  { %2600 = vpow2.f32 %v2102_v46 }
 0xbf8   :  { %v2599_v45 = vpop.eup %2598 }
 0xbf9   :  { %723 = vrot.lane.b32.xlu0 %v2599_v45, %s2772_s9 }
 0xbfa   :  { %v2601_v47 = vpop.eup %2600 }
 0xbfb   :  { %v717_v48 = vadd.f32 1.0, %v2601_v47 }
 0xbfd   :  { %2602 = vrcp.f32 %v717_v48 }
 0xc07   :  { %v2603_v49 = vpop.eup %2602 }
 0xc08   :  { %v721_v52 = vmul.f32 %v2603_v49, %v622_v36 }
 0xc6b   :  { %v724_v50 = vpop.permute.xlu0 %723 }
 0xc6c   :  { %v726_v51 = vmul.f32 %v2603_v49, %v724_v50  ;;  %v1228_v50 = vld [vmem:[%s3211_s5] sm:$0xff] }
 0xc6e   :  { %728 = vrot.lane.b32.xlu1 %v726_v51, %s2773_s3  ;;  %v1229_v51 = vld [vmem:[%s3211_s5 + $0x8] sm:$0xff] }
 0xce0   :  { %v729_v53 = vpop.permute.xlu1 %728 }
 0xce1   :  { %v731_v54 = vadd.f32 %v729_v53, %v721_v52  ;;  %v3035_v52 = vpack.c.bf16 %v1229_v51, %v1228_v50  ;;  %v1230_v53 = vld [vmem:[%s3211_s5 + $0x10] sm:$0xff] }
 0xce3   :  { %2604 = vtanh.f32 %v731_v54 }
 0xced   :  { %v2605_v55 = vpop.eup %2604 }
 0xcee   :  { %734 = vrot.lane.b32.xlu0 %v2605_v55, %s2772_s9 }
 0xd60   :  { %v735_v56 = vpop.permute.xlu0 %734 }
 0xd61   :  { %v737_v57 = vmul.f32 %v2603_v49, %v735_v56 }
 0xd63   :  { %739 = vrot.lane.b32.xlu1 %v737_v57, %s2773_s3 }
 0xdd5   :  { %v740_v58 = vpop.permute.xlu1 %739 }
 0xdd6   :  { %743 = vst.msk [vmem:[#allocation3 + $0x20] sm:$0xff] %vm204_vm2, %v740_v58  ;;  %2315 = vmatmul.mubr.msk.f32.vlgmr.msra.gmra.mrb[6].mxu1 %vm204_vm2, %v740_v58 }
 0xdd7   :  { %2495 = vmatpush3.bf16.msra.mxu1 %v2849_v8  ;;  %2336 = vmatprep.mubr.msk.f32.mxu1 %vm2770_vm0, %v2771_v1 }
 0xdd8   :  { %2496 = vmatprep.subr.bf16.mxu1 %v2769_v0 }
 0xddb   :  { %2498 = vmatpush3.bf16.msra.mxu1 %v2862_v12 }
 0xddc   :  { %2507 = vmatprep.subr.bf16.mxu1 %v2769_v0 }
 0xddd   :  { %v1075_v28 = vld [vmem:[#allocation3 + $0x20] sm:$0xff] }
 0xea9   :  { %v818_v63 = vpop.f32.mrb[6].mxu1 }
 0xeaa   :  { %v822_v2 = vadd.f32 %v818_v63, %v178_v60  ;;  %v2316_v3 = vpop.f32.mrb[7].mxu1  ;;  %v188_v63 = vadd.f32 %v2933_v61, %v2883_v13 }
 0xeac   :  { %2606 = vtanh.f32 %v822_v2  ;;  %v2104_v8 = vmul.f32 -1.442695, %v822_v2 }
 0xeae   :  { %2608 = vpow2.f32 %v2104_v8  ;;  %v3071_v8 = vld [vmem:[%s3212_s6] ss:$0 sm:$0xff]  ;;  %s2774_s6 = smov 96  }
 0xeb6   :  { %v2607_v4 = vpop.eup %2606 }
 0xeb7   :  { %832 = vrot.lane.b32.xlu0 %v2607_v4, %s2772_s9 }
 0xeb8   :  { %v2609_v5 = vpop.eup %2608 }
 0xeb9   :  { %v826_v6 = vadd.f32 1.0, %v2609_v5 }
 0xebb   :  { %2610 = vrcp.f32 %v826_v6 }
 0xec5   :  { %v2611_v7 = vpop.eup %2610 }
 0xec6   :  { %v830_v10 = vmul.f32 %v2611_v7, %v731_v54  ;;  %v1231_v54 = vld [vmem:[%s3211_s5 + $0x18] sm:$0xff] }
 0xec7   :  { %v3045_v55 = vpack.c.bf16 %v1231_v54, %v1230_v53 }
 0xf29   :  { %v833_v9 = vpop.permute.xlu0 %832 }
 0xf2a   :  { %v835_v12 = vmul.f32 %v2611_v7, %v833_v9 }
 0xf2c   :  { %837 = vrot.lane.b32.xlu1 %v835_v12, %s2773_s3 }
 0xf9e   :  { %v838_v11 = vpop.permute.xlu1 %837 }
 0xf9f   :  { %v840_v59 = vadd.f32 %v838_v11, %v830_v10 }
 0xfa1   :  { %2612 = vtanh.f32 %v840_v59 }
 0xfab   :  { %v2613_v17 = vpop.eup %2612 }
 0xfac   :  { %843 = vrot.lane.b32.xlu0 %v2613_v17, %s2772_s9 }
0x101e   :  { %v844_v18 = vpop.permute.xlu0 %843 }
0x101f   :  { %v846_v19 = vmul.f32 %v2611_v7, %v844_v18 }
0x1021   :  { %848 = vrot.lane.b32.xlu1 %v846_v19, %s2773_s3 }
0x1093   :  { %v849_v23 = vpop.permute.xlu1 %848 }
0x1094   :  { %852 = vst.msk [vmem:[#allocation3 + $0x28] sm:$0xff] %vm204_vm2, %v849_v23  ;;  %2326 = vmatmul.mubr.msk.f32.vlgmr.msra.gmra.mrb[12].mxu0 %vm204_vm2, %v849_v23 }
0x1095   :  { %2502 = vmatpush3.bf16.msra.mxu0 %v2499_v16  ;;  %2347 = vmatprep.mubr.msk.f32.mxu0 %vm204_vm2, %v1071_v24 }
0x1096   :  { %2504 = vmatprep.subr.bf16.mxu0 %v2503_v22 }
0x1099   :  { %2506 = vmatpush3.bf16.msra.mxu0 %v2503_v22 }
0x109a   :  { %2519 = vmatprep.subr.bf16.mxu0 %v2769_v0 }
0x109b   :  { %v1076_v29 = vld [vmem:[#allocation3 + $0x28] sm:$0xff] }
0x109c   :  { %2348 = vmatmul.mubr.msk.f32.vlgmr.msra.gmra.mrb[14].mxu0 %vm204_vm2, %v1072_v25 }
0x109d   :  { %2350 = vmatprep.mubr.msk.f32.mxu0 %vm204_vm2, %v1073_v26  ;;  %2521 = vmatpush3.bf16.msra.mxu0 %v3035_v52 }
0x109e   :  { %2522 = vmatprep.subr.bf16.mxu0 %v2769_v0 }
0x10a0   :  { %2351 = vmatmul.mubr.msk.f32.gmra.mrb[16].mxu0 %vm204_vm2, %v1074_v27 }
0x10a1   :  { %2353 = vmatprep.mubr.msk.f32.mxu0 %vm204_vm2, %v1075_v28  ;;  %2524 = vmatpush3.bf16.msra.mxu0 %v3045_v55 }
0x10a2   :  { %2531 = vmatprep.subr.bf16.mxu0 %v2769_v0 }
0x10a4   :  { %2354 = vmatmul.mubr.msk.f32.gmra.mrb[18].mxu0 %vm204_vm2, %v1076_v29 }
0x1167   :  { %v927_v31 = vpop.f32.mrb[12].mxu0 }
0x1168   :  { %v931_v32 = vadd.f32 %v927_v31, %v183_v30  ;;  %v2327_v33 = vpop.f32.mrb[13].mxu0 }
0x116a   :  { %2614 = vtanh.f32 %v931_v32  ;;  %v2106_v41 = vmul.f32 -1.442695, %v931_v32 }
0x116c   :  { %2616 = vpow2.f32 %v2106_v41 }
0x116f   :  { %v3013_v34 = vpop.f32.mrb[14].mxu0 }
0x1170   :  { %v1180_v35 = vpop.f32.mrb[15].mxu0 }
0x1171   :  { %v1181_v5 = vadd.f32 %v3071_v8, %v1180_v35 }
0x1173   :  { %v3015_v36 = vpop.f32.mrb[16].mxu0 }
0x1174   :  { %v2615_v37 = vpop.eup %2614  ;;  %v3017_v38 = vpop.f32.mrb[17].mxu0 }
0x1175   :  { %941 = vrot.lane.b32.xlu0 %v2615_v37, %s2772_s9  ;;  %v1186_v37 = vadd.f32 %v3013_v34, %v3071_v8 }
0x1176   :  { %v2617_v62 = vpop.eup %2616 }
0x1177   :  { %v3020_v39 = vpop.f32.mrb[18].mxu0  ;;  %v935_v42 = vadd.f32 1.0, %v2617_v62 }
0x1178   :  { %v3022_v40 = vpop.f32.mrb[19].mxu0 }
0x1179   :  { %2618 = vrcp.f32 %v935_v42 }
0x1183   :  { %v2619_v43 = vpop.eup %2618 }
0x1184   :  { %v939_v46 = vmul.f32 %v2619_v43, %v840_v59 }
0x11e7   :  { %v942_v44 = vpop.permute.xlu0 %941 }
0x11e8   :  { %v944_v45 = vmul.f32 %v2619_v43, %v942_v44 }
0x11ea   :  { %946 = vrot.lane.b32.xlu1 %v944_v45, %s2773_s3 }
0x125c   :  { %v947_v47 = vpop.permute.xlu1 %946 }
0x125d   :  { %v3025_v48 = vadd.f32 %v947_v47, %v939_v46 }
0x125f   :  { %2620 = vtanh.f32 %v3025_v48 }
0x1269   :  { %v2621_v49 = vpop.eup %2620 }
0x126a   :  { %952 = vrot.lane.b32.xlu0 %v2621_v49, %s2772_s9 }
0x12dc   :  { %v953_v56 = vpop.permute.xlu0 %952 }
0x12dd   :  { %v955_v57 = vmul.f32 %v2619_v43, %v953_v56 }
0x12df   :  { %957 = vrot.lane.b32.xlu1 %v955_v57, %s2773_s3 }
0x1351   :  { %v958_v58 = vpop.permute.xlu1 %957 }
0x1352   :  { %961 = vst.msk [vmem:[#allocation3 + $0x30] sm:$0xff] %vm204_vm2, %v958_v58  ;;  %2337 = vmatmul.mubr.msk.f32.vlgmr.msra.gmra.mrb[8].mxu1 %vm204_vm2, %v958_v58 }
0x1353   :  { %2509 = vmatpush3.bf16.msra.mxu1 %v3035_v52  ;;  %2367 = vmatprep.mubr.msk.f32.mxu1 %vm2770_vm0, %v2771_v1 }
0x1354   :  { %2510 = vmatprep.subr.bf16.mxu1 %v2769_v0 }
0x1357   :  { %2512 = vmatpush3.bf16.msra.mxu1 %v3045_v55 }
0x1358   :  { %2513 = vmatprep.subr.bf16.mxu1 %v2769_v0 }
0x1359   :  { %v1077_v60 = vld [vmem:[#allocation3 + $0x30] sm:$0xff] }
0x135a   :  { %2368 = vmatmul.mubr.f32.vlgmr.msra.gmra.mrb[10].mxu1 %v2771_v1  ;;  %2356 = vmatprep.mubr.msk.f32.mxu0 %vm204_vm2, %v1077_v60 }
0x135b   :  { %2515 = vmatpush3.bf16.msra.mxu1 %v3035_v52  ;;  %2378 = vmatprep.mubr.msk.f32.mxu1 %vm2770_vm0, %v2771_v1 }
0x135c   :  { %2516 = vmatprep.subr.bf16.mxu1 %v2769_v0 }
0x135f   :  { %2518 = vmatpush3.bf16.msra.mxu1 %v3045_v55 }
0x1360   :  { %2525 = vmatprep.subr.bf16.mxu1 %v2769_v0 }
0x1425   :  { %v1036_v2 = vpop.f32.mrb[8].mxu1 }
0x1426   :  { %v1040_v3 = vadd.f32 %v1036_v2, %v188_v63  ;;  %v2338_v4 = vpop.f32.mrb[9].mxu1 }
0x1428   :  { %v2108_v20 = vmul.f32 -1.442695, %v1040_v3 }
0x142d   :  { %v1298_v6 = vpop.f32.mrb[10].mxu1 }
0x142e   :  { %v1302_v7 = vadd.f32 %v1298_v6, %v1181_v5  ;;  %v2369_v9 = vpop.f32.mrb[11].mxu1 }
0x1430   :  { %2622 = vtanh.f32 %v1302_v7  ;;  %v2118_v10 = vmul.f32 -1.442695, %v1302_v7 }
0x1432   :  { %2624 = vpow2.f32 %v2118_v10 }
0x143a   :  { %v2623_v12 = vpop.eup %2622 }
0x143b   :  { %1312 = vrot.lane.b32.xlu0 %v2623_v12, %s2772_s9 }
0x143c   :  { %v2625_v13 = vpop.eup %2624 }
0x143d   :  { %v1306_v61 = vadd.f32 1.0, %v2625_v13 }
0x143f   :  { %2626 = vrcp.f32 %v1306_v61 }
0x1449   :  { %v2627_v11 = vpop.eup %2626 }
0x144a   :  { %v1310_v15 = vmul.f32 0.0, %v2627_v11 }
0x14ad   :  { %v1313_v59 = vpop.permute.xlu0 %1312 }
0x14ae   :  { %v1315_v14 = vmul.f32 %v2627_v11, %v1313_v59 }
0x14b0   :  { %1317 = vrot.lane.b32.xlu1 %v1315_v14, %s2773_s3 }
0x1522   :  { %v1318_v16 = vpop.permute.xlu1 %1317 }
0x1523   :  { %v1320_v17 = vadd.f32 %v1318_v16, %v1310_v15 }
0x1525   :  { %2628 = vtanh.f32 %v1320_v17 }
0x1526   :  { %2630 = vtanh.f32 %v1040_v3  ;;  %v1191_v3 = vadd.f32 %v3071_v8, %v3017_v38 }
0x1527   :  { %2632 = vpow2.f32 %v2108_v20 }
0x152f   :  { %v2629_v18 = vpop.eup %2628 }
0x1530   :  { %1323 = vrot.lane.b32.xlu0 %v2629_v18, %s2772_s9  ;;  %v2631_v19 = vpop.eup %2630 }
0x1531   :  { %v2633_v21 = vpop.eup %2632 }
0x1532   :  { %v1044_v22 = vadd.f32 1.0, %v2633_v21 }
0x1534   :  { %1050 = vrot.lane.b32.xlu0 %v2631_v19, %s2772_s9  ;;  %2634 = vrcp.f32 %v1044_v22  ;;  %v1196_v19 = vadd.f32 %v3015_v36, %v3071_v8 }
0x153e   :  { %v2635_v25 = vpop.eup %2634 }
0x153f   :  { %v1048_v29 = vmul.f32 %v2635_v25, %v3025_v48 }
0x15a2   :  { %v1324_v23 = vpop.permute.xlu0 %1323 }
0x15a3   :  { %v1326_v24 = vmul.f32 %v2627_v11, %v1324_v23 }
0x15a5   :  { %1329 = vrot.lane.b32.xlu1 %v1326_v24, %s2773_s3 }
0x15a6   :  { %v1051_v26 = vpop.permute.xlu0 %1050 }
0x15a7   :  { %v1053_v27 = vmul.f32 %v2635_v25, %v1051_v26 }
0x15a9   :  { %1055 = vrot.lane.b32.xlu0 %v1053_v27, %s2773_s3 }
0x1617   :  { %v1330_v28 = vpop.permute.xlu1 %1329 }
0x1618   :  { %2379 = vmatmul.mubr.msk.f32.vlgmr.msra.gmra.mrb[12].mxu1 %vm204_vm2, %v1330_v28 }
0x1619   :  { %2527 = vmatpush3.bf16.msra.mxu1 %v3035_v52  ;;  %2400 = vmatprep.mubr.msk.f32.mxu1 %vm2770_vm0, %v2771_v1 }
0x161a   :  { %2528 = vmatprep.subr.bf16.mxu1 %v2769_v0 }
0x161b   :  { %v1056_v30 = vpop.permute.xlu0 %1055 }
0x161c   :  { %v3086_v31 = vadd.f32 %v1056_v30, %v1048_v29 }
0x161d   :  { %2530 = vmatpush3.bf16.msra.mxu1 %v3045_v55 }
0x161e   :  { %2636 = vtanh.f32 %v3086_v31  ;;  %2537 = vmatprep.subr.bf16.mxu1 %v2769_v0 }
0x1628   :  { %v2637_v32 = vpop.eup %2636 }
0x1629   :  { %1061 = vrot.lane.b32.xlu0 %v2637_v32, %s2772_s9 }
0x169b   :  { %v1062_v33 = vpop.permute.xlu0 %1061 }
0x169c   :  { %v1064_v35 = vmul.f32 %v2635_v25, %v1062_v33 }
0x169e   :  { %1066 = vrot.lane.b32.xlu0 %v1064_v35, %s2773_s3 }
0x16eb   :  { %v1399_v41 = vpop.f32.mrb[12].mxu1 }
0x16ec   :  { %v1403_v62 = vadd.f32 %v1399_v41, %v1186_v37  ;;  %v2380_v42 = vpop.f32.mrb[13].mxu1 }
0x16ee   :  { %2638 = vtanh.f32 %v1403_v62  ;;  %v2120_v46 = vmul.f32 -1.442695, %v1403_v62  ;;  %v1201_v62 = vadd.f32 %v3071_v8, %v3022_v40 }
0x16f0   :  { %2640 = vpow2.f32 %v2120_v46 }
0x16f8   :  { %v2639_v43 = vpop.eup %2638 }
0x16f9   :  { %1413 = vrot.lane.b32.xlu1 %v2639_v43, %s2772_s9 }
0x16fa   :  { %v2641_v34 = vpop.eup %2640 }
0x16fb   :  { %v1407_v47 = vadd.f32 1.0, %v2641_v34 }
0x16fd   :  { %2642 = vrcp.f32 %v1407_v47 }
0x1707   :  { %v2643_v48 = vpop.eup %2642 }
0x1708   :  { %v1411_v51 = vmul.f32 %v2643_v48, %v1320_v17 }
0x1710   :  { %v1067_v44 = vpop.permute.xlu0 %1066 }
0x1711   :  { %1070 = vst.msk [vmem:[#allocation3 + $0x38] sm:$0xff] %vm204_vm2, %v1067_v44  ;;  %2034 = vst.msk [vmem:[#allocation7] sm:$0xff] %vm204_vm2, %v1067_v44 }
0x1718   :  { %v1078_v45 = vld [vmem:[#allocation3 + $0x38] sm:$0xff] }
0x1719   :  { %2357 = vmatmul.mubr.msk.f32.gmra.mrb[20].mxu0 %vm204_vm2, %v1078_v45 }
0x171a   :  { %2389 = vmatprep.mubr.msk.f32.mxu0 %vm2770_vm0, %v2771_v1 }
0x176b   :  { %v1414_v49 = vpop.permute.xlu1 %1413 }
0x176c   :  { %v1416_v50 = vmul.f32 %v2643_v48, %v1414_v49 }
0x176e   :  { %1418 = vrot.lane.b32.xlu1 %v1416_v50, %s2773_s3 }
0x17e0   :  { %v1419_v53 = vpop.permute.xlu1 %1418 }
0x17e1   :  { %v1421_v54 = vadd.f32 %v1419_v53, %v1411_v51 }
0x17e3   :  { %2644 = vtanh.f32 %v1421_v54 }
0x17ec   :  { %v3102_v56 = vpop.f32.mrb[20].mxu0 }
0x17ed   :  { %v2645_v57 = vpop.eup %2644  ;;  %v3104_v58 = vpop.f32.mrb[21].mxu0 }
0x17ee   :  { %1424 = vrot.lane.b32.xlu1 %v2645_v57, %s2772_s9 }
0x1860   :  { %v1425_v60 = vpop.permute.xlu1 %1424 }
0x1861   :  { %v1427_v63 = vmul.f32 %v2643_v48, %v1425_v60 }
0x1863   :  { %1430 = vrot.lane.b32.xlu1 %v1427_v63, %s2773_s3 }
0x18d5   :  { %v1431_v2 = vpop.permute.xlu1 %1430 }
0x18d6   :  { %2390 = vmatmul.mubr.msk.f32.vlgmr.msra.gmra.mrb[22].mxu0 %vm204_vm2, %v1431_v2  ;;  %v1206_v2 = vadd.f32 %v3020_v39, %v3071_v8 }
0x18d7   :  { %2533 = vmatpush3.bf16.msra.mxu0 %v3035_v52  ;;  %2411 = vmatprep.mubr.msk.f32.mxu0 %vm2770_vm0, %v2771_v1 }
0x18d8   :  { %2534 = vmatprep.subr.bf16.mxu0 %v2769_v0 }
0x18db   :  { %2536 = vmatpush3.bf16.msra.mxu0 %v3045_v55 }
0x18dc   :  { %2543 = vmatprep.subr.bf16.mxu0 %v2769_v0 }
0x19a9   :  { %v1500_v4 = vpop.f32.mrb[22].mxu0 }
0x19aa   :  { %v1504_v5 = vadd.f32 %v1500_v4, %v1191_v3  ;;  %v2391_v6 = vpop.f32.mrb[23].mxu0 }
0x19ac   :  { %2646 = vtanh.f32 %v1504_v5  ;;  %v2122_v9 = vmul.f32 -1.442695, %v1504_v5 }
0x19ae   :  { %2648 = vpow2.f32 %v2122_v9 }
0x19b6   :  { %v2647_v7 = vpop.eup %2646 }
0x19b7   :  { %1514 = vrot.lane.b32.xlu0 %v2647_v7, %s2772_s9 }
0x19b8   :  { %v2649_v12 = vpop.eup %2648 }
0x19b9   :  { %v1508_v10 = vadd.f32 1.0, %v2649_v12 }
0x19bb   :  { %2650 = vrcp.f32 %v1508_v10 }
0x19c5   :  { %v2651_v13 = vpop.eup %2650 }
0x19c6   :  { %v1512_v59 = vmul.f32 %v2651_v13, %v1421_v54 }
0x1a29   :  { %v1515_v61 = vpop.permute.xlu0 %1514 }
0x1a2a   :  { %v1517_v11 = vmul.f32 %v2651_v13, %v1515_v61 }
0x1a2c   :  { %1519 = vrot.lane.b32.xlu1 %v1517_v11, %s2773_s3 }
0x1a9e   :  { %v1520_v14 = vpop.permute.xlu1 %1519 }
0x1a9f   :  { %v1522_v38 = vadd.f32 %v1520_v14, %v1512_v59  ;;  %v1211_v14 = vadd.f32 %v3071_v8, %v3104_v58 }
0x1aa1   :  { %2652 = vtanh.f32 %v1522_v38 }
0x1aab   :  { %v2653_v15 = vpop.eup %2652 }
0x1aac   :  { %1525 = vrot.lane.b32.xlu0 %v2653_v15, %s2772_s9 }
0x1b1e   :  { %v1526_v16 = vpop.permute.xlu0 %1525 }
0x1b1f   :  { %v1528_v17 = vmul.f32 %v2651_v13, %v1526_v16 }
0x1b21   :  { %1531 = vrot.lane.b32.xlu1 %v1528_v17, %s2773_s3 }
0x1b93   :  { %v1532_v18 = vpop.permute.xlu1 %1531 }
0x1b94   :  { %2401 = vmatmul.mubr.msk.f32.vlgmr.msra.gmra.mrb[14].mxu1 %vm204_vm2, %v1532_v18 }
0x1b95   :  { %2539 = vmatpush3.bf16.msra.mxu1 %v3035_v52  ;;  %2422 = vmatprep.mubr.msk.f32.mxu1 %vm2770_vm0, %v2771_v1 }
0x1b96   :  { %2540 = vmatprep.subr.bf16.mxu1 %v2769_v0 }
0x1b99   :  { %2542 = vmatpush3.bf16.msra.mxu1 %v3045_v55 }
0x1b9a   :  { %2549 = vmatprep.subr.bf16.mxu1 %v2769_v0 }
0x1c67   :  { %v1601_v20 = vpop.f32.mrb[14].mxu1 }
0x1c68   :  { %v1605_v21 = vadd.f32 %v1601_v20, %v1196_v19  ;;  %v2402_v22 = vpop.f32.mrb[15].mxu1 }
0x1c6a   :  { %2654 = vtanh.f32 %v1605_v21  ;;  %v2124_v24 = vmul.f32 -1.442695, %v1605_v21 }
0x1c6c   :  { %2656 = vpow2.f32 %v2124_v24 }
0x1c74   :  { %v2655_v23 = vpop.eup %2654 }
0x1c75   :  { %1615 = vrot.lane.b32.xlu0 %v2655_v23, %s2772_s9 }
0x1c76   :  { %v2657_v25 = vpop.eup %2656 }
0x1c77   :  { %v1609_v26 = vadd.f32 1.0, %v2657_v25 }
0x1c79   :  { %2658 = vrcp.f32 %v1609_v26 }
0x1c83   :  { %v2659_v27 = vpop.eup %2658 }
0x1c84   :  { %v1613_v30 = vmul.f32 %v2659_v27, %v1522_v38 }
0x1ce7   :  { %v1616_v28 = vpop.permute.xlu0 %1615 }
0x1ce8   :  { %v1618_v29 = vmul.f32 %v2659_v27, %v1616_v28 }
0x1cea   :  { %1620 = vrot.lane.b32.xlu1 %v1618_v29, %s2773_s3 }
0x1d5c   :  { %v1621_v32 = vpop.permute.xlu1 %1620 }
0x1d5d   :  { %v1623_v36 = vadd.f32 %v1621_v32, %v1613_v30  ;;  %v1216_v30 = vadd.f32 %v3102_v56, %v3071_v8 }
0x1d5f   :  { %2660 = vtanh.f32 %v1623_v36 }
0x1d69   :  { %v2661_v33 = vpop.eup %2660 }
0x1d6a   :  { %1626 = vrot.lane.b32.xlu0 %v2661_v33, %s2772_s9 }
0x1ddc   :  { %v1627_v35 = vpop.permute.xlu0 %1626 }
0x1ddd   :  { %v1629_v37 = vmul.f32 %v2659_v27, %v1627_v35 }
0x1ddf   :  { %1632 = vrot.lane.b32.xlu1 %v1629_v37, %s2773_s3 }
0x1e51   :  { %v1633_v41 = vpop.permute.xlu1 %1632 }
0x1e52   :  { %2412 = vmatmul.mubr.msk.f32.vlgmr.msra.gmra.mrb[24].mxu0 %vm204_vm2, %v1633_v41 }
0x1e53   :  { %2545 = vmatpush3.bf16.msra.mxu0 %v3035_v52  ;;  %2433 = vmatprep.mubr.msk.f32.mxu0 %vm2770_vm0, %v2771_v1 }
0x1e54   :  { %2546 = vmatprep.subr.bf16.mxu0 %v2769_v0 }
0x1e57   :  { %2548 = vmatpush3.bf16.msra.mxu0 %v3045_v55 }
0x1f25   :  { %v1702_v42 = vpop.f32.mrb[24].mxu0 }
0x1f26   :  { %v1706_v43 = vadd.f32 %v1702_v42, %v1201_v62  ;;  %v2413_v44 = vpop.f32.mrb[25].mxu0 }
0x1f28   :  { %2662 = vtanh.f32 %v1706_v43  ;;  %v2126_v46 = vmul.f32 -1.442695, %v1706_v43 }
0x1f2a   :  { %2664 = vpow2.f32 %v2126_v46 }
0x1f32   :  { %v2663_v45 = vpop.eup %2662 }
0x1f33   :  { %1716 = vrot.lane.b32.xlu0 %v2663_v45, %s2772_s9 }
0x1f34   :  { %v2665_v34 = vpop.eup %2664 }
0x1f35   :  { %v1710_v47 = vadd.f32 1.0, %v2665_v34 }
0x1f37   :  { %2666 = vrcp.f32 %v1710_v47 }
0x1f41   :  { %v2667_v48 = vpop.eup %2666 }
0x1f42   :  { %v1714_v51 = vmul.f32 %v2667_v48, %v1623_v36 }
0x1fa5   :  { %v1717_v49 = vpop.permute.xlu0 %1716 }
0x1fa6   :  { %v1719_v50 = vmul.f32 %v2667_v48, %v1717_v49 }
0x1fa8   :  { %1721 = vrot.lane.b32.xlu1 %v1719_v50, %s2773_s3 }
0x201a   :  { %v1722_v53 = vpop.permute.xlu1 %1721 }
0x201b   :  { %v1724_v40 = vadd.f32 %v1722_v53, %v1714_v51 }
0x201d   :  { %2668 = vtanh.f32 %v1724_v40 }
0x2027   :  { %v2669_v54 = vpop.eup %2668 }
0x2028   :  { %1727 = vrot.lane.b32.xlu0 %v2669_v54, %s2772_s9 }
0x209a   :  { %v1728_v57 = vpop.permute.xlu0 %1727 }
0x209b   :  { %v1730_v60 = vmul.f32 %v2667_v48, %v1728_v57 }
0x209d   :  { %1733 = vrot.lane.b32.xlu1 %v1730_v60, %s2773_s3 }
0x210f   :  { %v1734_v63 = vpop.permute.xlu1 %1733 }
0x2110   :  { %2423 = vmatmul.mubr.msk.f32.vlgmr.msra.gmra.mrb[16].mxu1 %vm204_vm2, %v1734_v63 }
0x2111   :  { %2551 = vmatpush3.bf16.msra.mxu1 %v3035_v52  ;;  %2444 = vmatprep.mubr.msk.f32.mxu1 %vm2770_vm0, %v2771_v1 }
0x2112   :  { %2552 = vmatprep.subr.bf16.mxu1 %v2769_v0 }
0x2115   :  { %2554 = vmatpush3.bf16.msra.mxu1 %v3045_v55 }
0x21e3   :  { %v1803_v3 = vpop.f32.mrb[16].mxu1 }
0x21e4   :  { %v1807_v4 = vadd.f32 %v1803_v3, %v1206_v2  ;;  %v2424_v5 = vpop.f32.mrb[17].mxu1 }
0x21e6   :  { %2670 = vtanh.f32 %v1807_v4  ;;  %v2128_v7 = vmul.f32 -1.442695, %v1807_v4 }
0x21e8   :  { %2672 = vpow2.f32 %v2128_v7 }
0x21f0   :  { %v2671_v6 = vpop.eup %2670 }
0x21f1   :  { %1817 = vrot.lane.b32.xlu0 %v2671_v6, %s2772_s9 }
0x21f2   :  { %v2673_v52 = vpop.eup %2672 }
0x21f3   :  { %v1811_v9 = vadd.f32 1.0, %v2673_v52 }
0x21f5   :  { %2674 = vrcp.f32 %v1811_v9 }
0x21ff   :  { %v2675_v1 = vpop.eup %2674 }
0x2200   :  { %v1815_v55 = vmul.f32 %v2675_v1, %v1724_v40 }
0x2263   :  { %v1818_v12 = vpop.permute.xlu0 %1817 }
0x2264   :  { %v1820_v0 = vmul.f32 %v2675_v1, %v1818_v12 }
0x2266   :  { %1822 = vrot.lane.b32.xlu1 %v1820_v0, %s2773_s3 }
0x22d8   :  { %v1823_v10 = vpop.permute.xlu1 %1822 }
0x22d9   :  { %v1825_v39 = vadd.f32 %v1823_v10, %v1815_v55 }
0x22db   :  { %2676 = vtanh.f32 %v1825_v39 }
0x22e5   :  { %v2677_v13 = vpop.eup %2676 }
0x22e6   :  { %1828 = vrot.lane.b32.xlu0 %v2677_v13, %s2772_s9 }
0x2358   :  { %v1829_v61 = vpop.permute.xlu0 %1828 }
0x2359   :  { %v1831_v11 = vmul.f32 %v2675_v1, %v1829_v61 }
0x235b   :  { %1834 = vrot.lane.b32.xlu1 %v1831_v11, %s2773_s3 }
0x23cd   :  { %v1835_v59 = vpop.permute.xlu1 %1834 }
0x23ce   :  { %2434 = vmatmul.mubr.msk.f32.vlgmr.msra.gmra.mrb[26].mxu0 %vm204_vm2, %v1835_v59 }
0x24a1   :  { %v1904_v38 = vpop.f32.mrb[26].mxu0 }
0x24a2   :  { %v1908_v15 = vadd.f32 %v1904_v38, %v1211_v14  ;;  %v2435_v16 = vpop.f32.mrb[27].mxu0 }
0x24a4   :  { %2678 = vtanh.f32 %v1908_v15  ;;  %v2130_v18 = vmul.f32 -1.442695, %v1908_v15 }
0x24a6   :  { %2680 = vpow2.f32 %v2130_v18 }
0x24ae   :  { %v2679_v17 = vpop.eup %2678 }
0x24af   :  { %1918 = vrot.lane.b32.xlu0 %v2679_v17, %s2772_s9 }
0x24b0   :  { %v2681_v19 = vpop.eup %2680 }
0x24b1   :  { %v1912_v20 = vadd.f32 1.0, %v2681_v19 }
0x24b3   :  { %2682 = vrcp.f32 %v1912_v20 }
0x24bd   :  { %v2683_v21 = vpop.eup %2682 }
0x24be   :  { %v1916_v24 = vmul.f32 %v2683_v21, %v1825_v39 }
0x2521   :  { %v1919_v22 = vpop.permute.xlu0 %1918 }
0x2522   :  { %v1921_v23 = vmul.f32 %v2683_v21, %v1919_v22 }
0x2524   :  { %1923 = vrot.lane.b32.xlu1 %v1921_v23, %s2773_s3 }
0x2596   :  { %v1924_v25 = vpop.permute.xlu1 %1923 }
0x2597   :  { %v1926_v58 = vadd.f32 %v1924_v25, %v1916_v24 }
0x2599   :  { %2684 = vtanh.f32 %v1926_v58 }
0x25a3   :  { %v2685_v26 = vpop.eup %2684 }
0x25a4   :  { %1929 = vrot.lane.b32.xlu0 %v2685_v26, %s2772_s9 }
0x2616   :  { %v1930_v27 = vpop.permute.xlu0 %1929 }
0x2617   :  { %v1932_v28 = vmul.f32 %v2683_v21, %v1930_v27 }
0x2619   :  { %1935 = vrot.lane.b32.xlu1 %v1932_v28, %s2773_s3 }
0x268b   :  { %v1936_v29 = vpop.permute.xlu1 %1935 }
0x268c   :  { %2445 = vmatmul.mubr.msk.f32.vlgmr.msra.gmra.mrb[18].mxu1 %vm204_vm2, %v1936_v29 }
0x275f   :  { %v2005_v32 = vpop.f32.mrb[18].mxu1 }
0x2760   :  { %v2009_v36 = vadd.f32 %v2005_v32, %v1216_v30  ;;  %v2446_v33 = vpop.f32.mrb[19].mxu1 }
0x2762   :  { %2686 = vtanh.f32 %v2009_v36  ;;  %v2132_v37 = vmul.f32 -1.442695, %v2009_v36 }
0x2764   :  { %2688 = vpow2.f32 %v2132_v37 }
0x276c   :  { %v2687_v35 = vpop.eup %2686 }
0x276d   :  { %2019 = vrot.lane.b32.xlu0 %v2687_v35, %s2772_s9 }
0x276e   :  { %v2689_v41 = vpop.eup %2688 }
0x276f   :  { %v2013_v62 = vadd.f32 1.0, %v2689_v41 }
0x2771   :  { %2690 = vrcp.f32 %v2013_v62 }
0x277b   :  { %v2691_v42 = vpop.eup %2690 }
0x277c   :  { %v2017_v45 = vmul.f32 %v2691_v42, %v1926_v58 }
0x27df   :  { %v2020_v43 = vpop.permute.xlu0 %2019 }
0x27e0   :  { %v2022_v44 = vmul.f32 %v2691_v42, %v2020_v43 }
0x27e2   :  { %2024 = vrot.lane.b32.xlu1 %v2022_v44, %s2773_s3 }
0x2854   :  { %v2025_v46 = vpop.permute.xlu1 %2024 }
0x2855   :  { %v2027_v8 = vadd.f32 %v2025_v46, %v2017_v45 }
0x2857   :  { %2692 = vtanh.f32 %v2027_v8 }
0x2861   :  { %v2693_v56 = vpop.eup %2692 }
0x2862   :  { %2030 = vrot.lane.b32.xlu0 %v2693_v56, %s2772_s9  ;;  %s2716_s9 = scalar_lea.vmem %s2058_s19, 256 }
0x2863   :  { %p2717_p8 = scmp.ne.s32.totalorder %s2058_s19, %s2716_s9  ;;  %p2722_p10 = scmp.lt.s32.totalorder %s2716_s9, %s2716_s9 }
0x2865   :  { %p2723_p11 = por %p2722_p10, %p2721_p9 }
0x2866   :  { %2042 = vrot.lane.b32.xlu0 %v3086_v31, %s2774_s6 }
0x2867   :  { %p2724_p12 = pnand %p2723_p11, %p2717_p8 }
0x28d4   :  { %v2031_v34 = vpop.permute.xlu0 %2030 }
0x28d5   :  { %v2033_v47 = vmul.f32 %v2691_v42, %v2031_v34 }
0x28d7   :  { %2036 = vrot.lane.b32.xlu1 %v2033_v47, %s2773_s3 }
0x28d8   :  { %v2043_v48 = vpop.permute.xlu0 %2042 }
0x28d9   :  { %2045 = vst.msk [vmem:[#allocation8] sm:$0xff] %vm204_vm2, %v2043_v48 }
0x28db   :  { %2047 = vrot.lane.b32.xlu1 %v2027_v8, %s2774_s6 }
0x2949   :  { %v2037_v49 = vpop.permute.xlu1 %2036 }
0x294a   :  { %2040 = vst.msk [vmem:[#allocation7 + $0x8] sm:$0xff] %vm204_vm2, %v2037_v49 }
0x294b   :  { %2727 = shalt.err (!%p2724_p12)
}
0x294c   :  { %s2728_s22 = scalar_lea.hbm %s3213_s7, 256 }
0x294d   :  { %p2729_p13 = scmp.ne.s32.totalorder %s3213_s7, %s2728_s22  ;;  %p2732_p0 = scmp.lt.u32.totalorder %s2728_s22, %s3213_s7 }
0x294f   :  { %p2734_p1 = pnand %p2732_p0, %p2729_p13 }
0x2951   :  { %2737 = shalt.err (!%p2734_p1)
}
0x2952   :  { %2063 = dma.vmem_to_hbm [thread:$0]  %s2058_s19, 256, %s3213_s7, [#allocation6], %s2767_s15, %s2767_s15, %s2768_s16   ;;  %v2048_v31 = vpop.permute.xlu1 %2047 }
0x2953   :  { %2051 = vst.msk [vmem:[#allocation8 + $0x8] sm:$0xff] %vm204_vm2, %v2048_v31  ;;  %s2738_s28 = scalar_lea.vmem %s2070_s21, 256  ;;  %p2743_p3 = scmp.lt.s32.totalorder %s2070_s21, %s2070_s21 }
0x2954   :  { %p2739_p2 = scmp.ne.s32.totalorder %s2070_s21, %s2738_s28  ;;  %p2744_p4 = scmp.lt.s32.totalorder %s2738_s28, %s2738_s28 }
0x2956   :  { %p2745_p5 = por %p2744_p4, %p2743_p3 }
0x2958   :  { %p2746_p6 = pnand %p2745_p5, %p2739_p2 }
0x295a   :  { %2749 = shalt.err (!%p2746_p6)
}
0x295b   :  { %s2750_s2 = scalar_lea.hbm %s3214_s8, 256 }
0x295c   :  { %p2751_p7 = scmp.ne.s32.totalorder %s3214_s8, %s2750_s2  ;;  %p2754_p8 = scmp.lt.u32.totalorder %s2750_s2, %s3214_s8 }
0x295e   :  { %p2756_p9 = pnand %p2754_p8, %p2751_p7 }
0x2960   :  { %2759 = shalt.err (!%p2756_p9)
}
0x2961   :  { %2075 = dma.vmem_to_hbm [thread:$0]  %s2070_s21, 256, %s3214_s8, [#allocation9], %s2767_s15, %s2767_s15, %s2768_s16  }
0x2962   :  { %2762 = dma.done.wait [#allocation6], 256  }
0x2963   :  { %2763 = vsyncadd [#allocation6], 4294967040 }
0x2964   :  { %2764 = dma.done.wait [#allocation9], 256  }
0x2965   :  { %2765 = vsyncadd [#allocation9], 4294967040 }
0x2966   :  { %2082 = vsyncpa [#allocation5], 1 }
0x2967   :  { %2083 = vsyncpa [#allocation6], 1 }
0x2968   :  { %2084 = vsyncpa [#allocation9], 1 }

</bundles_post_ra>
